<compile_context>
chip_gen: v5e
topology: v5e:2x2
jax: 0.10.0
libtpu: 0.0.40
codegen_flags: <defaults>
</compile_context>

<pallas_src>
import jax
import jax.numpy as jnp
from jax.experimental import pallas as pl
from jax.experimental.pallas import tpu as pltpu


H1, H2 = 512, 256
OUT_PAD = 128  # 256->1 head padded to 128 lanes for lane-aligned MXU operands
               # (same MXU cycles as N=1); only column 0 is real and only it is stored.


def _discriminator_kernel(x_ref, w1_ref, b1_ref, w2_ref, b2_ref, w3_ref, b3_ref, o_ref):
    # Cast the f32 activation tile to bf16 in-register (VPU, hidden under the MXU);
    # no wrapper-side cast pass means the activations cross HBM exactly once as f32.
    x = x_ref[...].astype(w1_ref.dtype)

    # Linear(in_feat -> 512) + LeakyReLU(0.2); bf16 operands, f32 MXU accumulation.
    h1 = jnp.dot(x, w1_ref[...], preferred_element_type=jnp.float32) + b1_ref[...]
    h1 = jnp.maximum(h1, 0.2 * h1)

    # Linear(512 -> 256) + LeakyReLU(0.2)
    h2 = jnp.dot(h1.astype(w2_ref.dtype), w2_ref[...],
                 preferred_element_type=jnp.float32) + b2_ref[...]
    h2 = jnp.maximum(h2, 0.2 * h2)

    # Linear(256 -> 1): MXU matmul against the 128-lane-padded head, then slice the
    # single real column BEFORE the sigmoid so the EUP work and the HBM writeback
    # are (tb, 1) instead of (tb, 128).
    h3 = jnp.dot(h2.astype(w3_ref.dtype), w3_ref[...],
                 preferred_element_type=jnp.float32)
    v = h3[:, 0:1] + b3_ref[...]                               # (tb, 1)
    e = jnp.exp(-v)                                            # EUP
    # approx reciprocal => ~1e-3-level relative error vs exact sigmoid (documented).
    o_ref[...] = pl.reciprocal(1.0 + e, approx=True).astype(o_ref.dtype)


def _round_up(x, m):
    return ((x + m - 1) // m) * m


def _pick_tile_b(batch, in_feat, tile_b, vmem_budget_bytes):
    """Batch tile: as large as the VMEM budget allows (double-buffered f32 input tile
    + resident bf16 weights), capped at `tile_b`, and split so the grid has >= 2
    steps whenever the batch allows it (keeps v7x's second TensorCore busy)."""
    weight_bytes = 2 * 2 * (in_feat * H1 + H1 * H2 + H2 * OUT_PAD)  # bf16, x2 buffers
    avail = max(vmem_budget_bytes - weight_bytes, 1 << 20)
    tb_vmem = max(8, (avail // (2 * 4 * in_feat)) // 8 * 8)         # f32 input, x2 buffers
    tb = min(tile_b, tb_vmem)
    if tb >= batch:
        tb = _round_up(pl.cdiv(batch, 2), 8)
    return max(8, min(tb, _round_up(batch, 8)))


def discriminator_forward(img, params, *, tile_b=1024, compute_dtype=jnp.bfloat16,
                          vmem_budget_bytes=14 << 20):
    """img: [B, C, H, W] float32. Returns validity: [B] float32 (sigmoid output)."""
    B = img.shape[0]
    in_feat = int(img.shape[1] * img.shape[2] * img.shape[3])

    # Free metadata reshape only -- the cast to bf16 happens inside the kernel.
    x = img.reshape(B, in_feat)

    # Weights cast/padded once in the wrapper (tiny, resident in VMEM across steps).
    w1 = params["w1"].astype(compute_dtype)
    w2 = params["w2"].astype(compute_dtype)
    w3 = jnp.zeros((H2, OUT_PAD), compute_dtype).at[:, 0].set(
        params["w3"][:, 0].astype(compute_dtype))
    b1 = params["b1"].astype(jnp.float32)
    b2 = params["b2"].astype(jnp.float32)
    b3 = params["b3"].astype(jnp.float32).reshape(1, 1)

    tb = _pick_tile_b(B, in_feat, tile_b, vmem_budget_bytes)
    grid = (pl.cdiv(B, tb),)

    # Constant index_map -> Mosaic keeps these blocks resident; no per-step re-DMA.
    # (For very large in_feat on v7x one could further request single-buffering on
    # the weight specs and/or tile the reduction axis; not needed at these sizes.)
    resident = lambda a: pl.BlockSpec(a.shape, lambda i: (0,) * a.ndim)

    flops = 2 * B * (in_feat * H1 + H1 * H2 + H2 * OUT_PAD)
    bytes_accessed = (B * in_feat * 4 + B * 4
                      + 2 * (in_feat * H1 + H1 * H2 + H2 * OUT_PAD)
                      + 4 * (H1 + H2 + 1))
    cost = pl.CostEstimate(flops=flops, transcendentals=2 * B,
                           bytes_accessed=bytes_accessed)

    # NOTE: when B is not a multiple of tb, the padded input rows hold undefined data;
    # this is safe because every op is row-independent and those output rows are
    # masked/discarded. Do not add cross-row reductions to this kernel.
    out = pl.pallas_call(
        _discriminator_kernel,
        out_shape=jax.ShapeDtypeStruct((B, 1), jnp.float32),
        grid=grid,
        in_specs=[
            pl.BlockSpec((tb, in_feat), lambda i: (i, 0)),
            resident(w1), resident(b1),
            resident(w2), resident(b2),
            resident(w3), resident(b3),
        ],
        out_specs=pl.BlockSpec((tb, 1), lambda i: (i, 0)),
        compiler_params=pltpu.CompilerParams(
            dimension_semantics=("parallel",),
        ),
        cost_estimate=cost,
    )(x, w1, b1, w2, b2, w3, b3)

    # Equivalent of torch's .view(-1) on the (B, 1) result.
    return out.reshape(-1)


def init_params(key, in_features, h1=H1, h2=H2, out=1):
    """Deterministic init mimicking torch.nn.Linear default (uniform +/- 1/sqrt(fan_in)).
    Weights stored as [in, out] (already transposed vs torch)."""
    ks = jax.random.split(key, 6)

    def lin(kw, kb, fan_in, fan_out):
        bound = 1.0 / jnp.sqrt(fan_in)
        w = jax.random.uniform(kw, (fan_in, fan_out), jnp.float32, -bound, bound)
        b = jax.random.uniform(kb, (1, fan_out), jnp.float32, -bound, bound)
        return w, b

    w1, b1 = lin(ks[0], ks[1], in_features, h1)
    w2, b2 = lin(ks[2], ks[3], h1, h2)
    w3, b3 = lin(ks[4], ks[5], h2, out)
    return {"w1": w1, "b1": b1, "w2": w2, "b2": b2, "w3": w3, "b3": b3}


if __name__ == "__main__":
    key = jax.random.PRNGKey(0)
    k_img, k_par = jax.random.split(key)

    # Small image shape consistent with the module: img_shape = (4, 16, 16)
    B, C, H, W = 2, 4, 16, 16
    img = jax.random.normal(k_img, (B, C, H, W), dtype=jnp.float32)

    params = init_params(k_par, in_features=C * H * W)

    validity = jax.block_until_ready(discriminator_forward(img, params))
    assert validity.shape == (B,)

    # Pure-JAX references.
    def ref(img, p, dt):
        x = img.reshape(img.shape[0], -1).astype(dt)
        h = jnp.dot(x, p["w1"].astype(dt), preferred_element_type=jnp.float32) + p["b1"]
        h = jnp.maximum(h, 0.2 * h)
        h = jnp.dot(h.astype(dt), p["w2"].astype(dt), preferred_element_type=jnp.float32) + p["b2"]
        h = jnp.maximum(h, 0.2 * h)
        h = jnp.dot(h.astype(dt), p["w3"].astype(dt), preferred_element_type=jnp.float32) + p["b3"]
        return jax.nn.sigmoid(h).reshape(-1)

    expected_bf16 = ref(img, params, jnp.bfloat16)   # operand-precision-matched reference
    expected_f32 = ref(img, params, jnp.float32)     # module-semantics reference

    assert jnp.allclose(validity, expected_bf16, atol=5e-3, rtol=5e-3), (validity, expected_bf16)
    assert jnp.allclose(validity, expected_f32, atol=3e-2, rtol=3e-2), (validity, expected_f32)
    print("KERNEL_OK")
</pallas_src>

<mosaic_0001>
module attributes {stable_mosaic.version = 11 : i64} {
  func.func @_discriminator_kernel(%arg0: i32, %arg1: memref<8x1024xf32, #tpu.memory_space<vmem>>, %arg2: memref<1024x512xbf16, #tpu.memory_space<vmem>>, %arg3: memref<1x512xf32, #tpu.memory_space<vmem>>, %arg4: memref<512x256xbf16, #tpu.memory_space<vmem>>, %arg5: memref<1x256xf32, #tpu.memory_space<vmem>>, %arg6: memref<256x128xbf16, #tpu.memory_space<vmem>>, %arg7: memref<1x1xf32, #tpu.memory_space<vmem>>, %arg8: memref<8x1xf32, #tpu.memory_space<vmem>>) attributes {dimension_semantics = [#tpu.dimension_semantics<parallel>], iteration_bounds = array<i64: 1>, scalar_prefetch = 0 : i64, scratch_operands = 0 : i64, tpu.core_type = #tpu.core_type<tc>, window_params = [{transform_indices = @transform_0, window_bounds = array<i64: 8, 1024>}, {pipeline_mode = #tpu.pipeline_mode<synchronous>, transform_indices = @transform_1, window_bounds = array<i64: 1024, 512>}, {pipeline_mode = #tpu.pipeline_mode<synchronous>, transform_indices = @transform_2, window_bounds = array<i64: 1, 512>}, {pipeline_mode = #tpu.pipeline_mode<synchronous>, transform_indices = @transform_3, window_bounds = array<i64: 512, 256>}, {pipeline_mode = #tpu.pipeline_mode<synchronous>, transform_indices = @transform_4, window_bounds = array<i64: 1, 256>}, {pipeline_mode = #tpu.pipeline_mode<synchronous>, transform_indices = @transform_5, window_bounds = array<i64: 256, 128>}, {pipeline_mode = #tpu.pipeline_mode<synchronous>, transform_indices = @transform_6, window_bounds = array<i64: 1, 1>}, {transform_indices = @transform_7, window_bounds = array<i64: 8, 1>}]} {
    %c0 = arith.constant 0 : index
    %c0_0 = arith.constant 0 : index
    %0 = vector.load %arg1[%c0, %c0_0] : memref<8x1024xf32, #tpu.memory_space<vmem>>, vector<8x1024xf32>
    %1 = arith.truncf %0 : vector<8x1024xf32> to vector<8x1024xbf16>
    %c0_1 = arith.constant 0 : index
    %c0_2 = arith.constant 0 : index
    %2 = vector.load %arg2[%c0_1, %c0_2] : memref<1024x512xbf16, #tpu.memory_space<vmem>>, vector<1024x512xbf16>
    %cst = arith.constant dense<0.000000e+00> : vector<8x512xf32>
    %3 = tpu.matmul %1, %2, %cst {dimension_numbers = #tpu.dot_dimension_numbers<[1], [0], [0], [1], [0, 0, 1, 1], [], []>} : vector<8x1024xbf16>, vector<1024x512xbf16>, vector<8x512xf32> -> vector<8x512xf32>
    %c0_3 = arith.constant 0 : index
    %c0_4 = arith.constant 0 : index
    %4 = vector.load %arg3[%c0_3, %c0_4] : memref<1x512xf32, #tpu.memory_space<vmem>>, vector<1x512xf32>
    %5 = vector.broadcast %4 : vector<1x512xf32> to vector<8x512xf32>
    %6 = arith.addf %3, %5 : vector<8x512xf32>
    %cst_5 = arith.constant 2.000000e-01 : f32
    %7 = vector.broadcast %cst_5 : f32 to vector<8x512xf32>
    %8 = arith.mulf %7, %6 : vector<8x512xf32>
    %9 = arith.maximumf %6, %8 : vector<8x512xf32>
    %10 = arith.truncf %9 : vector<8x512xf32> to vector<8x512xbf16>
    %c0_6 = arith.constant 0 : index
    %c0_7 = arith.constant 0 : index
    %11 = vector.load %arg4[%c0_6, %c0_7] : memref<512x256xbf16, #tpu.memory_space<vmem>>, vector<512x256xbf16>
    %cst_8 = arith.constant dense<0.000000e+00> : vector<8x256xf32>
    %12 = tpu.matmul %10, %11, %cst_8 {dimension_numbers = #tpu.dot_dimension_numbers<[1], [0], [0], [1], [0, 0, 1, 1], [], []>} : vector<8x512xbf16>, vector<512x256xbf16>, vector<8x256xf32> -> vector<8x256xf32>
    %c0_9 = arith.constant 0 : index
    %c0_10 = arith.constant 0 : index
    %13 = vector.load %arg5[%c0_9, %c0_10] : memref<1x256xf32, #tpu.memory_space<vmem>>, vector<1x256xf32>
    %14 = vector.broadcast %13 : vector<1x256xf32> to vector<8x256xf32>
    %15 = arith.addf %12, %14 : vector<8x256xf32>
    %cst_11 = arith.constant 2.000000e-01 : f32
    %16 = vector.broadcast %cst_11 : f32 to vector<8x256xf32>
    %17 = arith.mulf %16, %15 : vector<8x256xf32>
    %18 = arith.maximumf %15, %17 : vector<8x256xf32>
    %19 = arith.truncf %18 : vector<8x256xf32> to vector<8x256xbf16>
    %c0_12 = arith.constant 0 : index
    %c0_13 = arith.constant 0 : index
    %20 = vector.load %arg6[%c0_12, %c0_13] : memref<256x128xbf16, #tpu.memory_space<vmem>>, vector<256x128xbf16>
    %cst_14 = arith.constant dense<0.000000e+00> : vector<8x128xf32>
    %21 = tpu.matmul %19, %20, %cst_14 {dimension_numbers = #tpu.dot_dimension_numbers<[1], [0], [0], [1], [0, 0, 1, 1], [], []>} : vector<8x256xbf16>, vector<256x128xbf16>, vector<8x128xf32> -> vector<8x128xf32>
    %22 = vector.extract_strided_slice %21 {offsets = [0, 0], sizes = [8, 1], strides = [1, 1]} : vector<8x128xf32> to vector<8x1xf32>
    %c0_15 = arith.constant 0 : index
    %c0_16 = arith.constant 0 : index
    %23 = vector.load %arg7[%c0_15, %c0_16] : memref<1x1xf32, #tpu.memory_space<vmem>>, vector<1x1xf32>
    %24 = vector.broadcast %23 : vector<1x1xf32> to vector<8x1xf32>
    %25 = arith.addf %22, %24 : vector<8x1xf32>
    %cst_17 = arith.constant 0.000000e+00 : f32
    %26 = vector.broadcast %cst_17 : f32 to vector<8x1xf32>
    %27 = arith.subf %26, %25 : vector<8x1xf32>
    %28 = math.exp %27 : vector<8x1xf32>
    %cst_18 = arith.constant 1.000000e+00 : f32
    %29 = vector.broadcast %cst_18 : f32 to vector<8x1xf32>
    %30 = arith.addf %29, %28 : vector<8x1xf32>
    %31 = tpu.reciprocal %30 {approx = true} : vector<8x1xf32> -> vector<8x1xf32>
    %c0_19 = arith.constant 0 : index
    %c0_20 = arith.constant 0 : index
    %32 = vector.load %arg8[%c0_19, %c0_20] : memref<8x1xf32, #tpu.memory_space<vmem>>, vector<8x1xf32>
    tpu.vector_store %arg8[%c0_19, %c0_20], %31 {strides = array<i32>} : memref<8x1xf32, #tpu.memory_space<vmem>>, vector<8x1xf32>,
    return
  }
  func.func @transform_0(%arg0: i32) -> (i32, i32) {
    %c0_i32 = arith.constant 0 : i32
    %c0_i32_0 = arith.constant 0 : i32
    return %arg0, %c0_i32 : i32, i32
  }
  func.func @transform_1(%arg0: i32) -> (i32, i32) {
    %c0_i32 = arith.constant 0 : i32
    %c0_i32_0 = arith.constant 0 : i32
    %c0_i32_1 = arith.constant 0 : i32
    return %c0_i32, %c0_i32_0 : i32, i32
  }
  func.func @transform_2(%arg0: i32) -> (i32, i32) {
    %c0_i32 = arith.constant 0 : i32
    %c0_i32_0 = arith.constant 0 : i32
    %c0_i32_1 = arith.constant 0 : i32
    return %c0_i32, %c0_i32_0 : i32, i32
  }
  func.func @transform_3(%arg0: i32) -> (i32, i32) {
    %c0_i32 = arith.constant 0 : i32
    %c0_i32_0 = arith.constant 0 : i32
    %c0_i32_1 = arith.constant 0 : i32
    return %c0_i32, %c0_i32_0 : i32, i32
  }
  func.func @transform_4(%arg0: i32) -> (i32, i32) {
    %c0_i32 = arith.constant 0 : i32
    %c0_i32_0 = arith.constant 0 : i32
    %c0_i32_1 = arith.constant 0 : i32
    return %c0_i32, %c0_i32_0 : i32, i32
  }
  func.func @transform_5(%arg0: i32) -> (i32, i32) {
    %c0_i32 = arith.constant 0 : i32
    %c0_i32_0 = arith.constant 0 : i32
    %c0_i32_1 = arith.constant 0 : i32
    return %c0_i32, %c0_i32_0 : i32, i32
  }
  func.func @transform_6(%arg0: i32) -> (i32, i32) {
    %c0_i32 = arith.constant 0 : i32
    %c0_i32_0 = arith.constant 0 : i32
    %c0_i32_1 = arith.constant 0 : i32
    return %c0_i32, %c0_i32_0 : i32, i32
  }
  func.func @transform_7(%arg0: i32) -> (i32, i32) {
    %c0_i32 = arith.constant 0 : i32
    %c0_i32_0 = arith.constant 0 : i32
    return %arg0, %c0_i32 : i32, i32
  }
}

</mosaic_0001>

<bundles_post_ra>
// kernel: tpu_custom_call.1
= control target key start
LH: loop header
LB: loop body
LE: loop exit
PB: predicated region body
PF: predicated region fallthrough
CT: control target
= control target key end

     0   :  { %s4821_s0 = inlined_call_operand.hbm [shape: f32[2,1024], index: 0, kind: input, shape index: {}]   ;;  %s4822_s1 = inlined_call_operand.hbm [shape: bf16[1024,512], index: 1, kind: input, shape index: {}]   ;;  %s4823_s2 = inlined_call_operand.hbm [shape: f32[1,512], index: 2, kind: input, shape index: {}]   ;;  %s4824_s3 = inlined_call_operand.hbm [shape: bf16[512,256], index: 3, kind: input, shape index: {}]   ;;  %s4825_s4 = inlined_call_operand.vmem [shape: f32[1,256], index: 4, kind: input, shape index: {}]   ;;  %s4826_s5 = inlined_call_operand.hbm [shape: bf16[256,128], index: 5, kind: input, shape index: {}]   ;;  %s4827_s6 = inlined_call_operand.<no memory space> [shape: f32[1,1], index: 6, kind: input, shape index: {}]   ;;  %s4828_s7 = inlined_call_operand.vmem [shape: f32[2,1], index: 7, kind: output, shape index: {}]  }
   0x1   :  { %v12_v0 = vstv %s4827_s6 }
   0x2   :  { %13 = vst [vmem:[#allocation2] sm:$0x1] %v12_v0 }
   0x3   :  { %14 = vsyncpa [#allocation4], 0 }
   0x4   :  { %15 = vsyncpa [#allocation6], 0 }
   0x5   :  { %16 = vsyncpa [#allocation9], 0 }
   0x6   :  { %20 = vsyncadd [#allocation4], 768  ;;  %s34_s28 = sshll.u32 %s4822_s1, 4  ;;  %s4666_s29 = smov [#allocation5]   ;;  %s35_s28 = int_to_ptr.hbm [resolvable:$true] %s34_s28 }
   0x7   :  { %s36_s30 = sshll.u32 %s4666_s29, 4  ;;  %s58_s10 = sshll.u32 %s4824_s3, 4  ;;  %s37_s30 = int_to_ptr.vmem [resolvable:$true] %s36_s30  ;;  %s59_s10 = int_to_ptr.hbm [resolvable:$true] %s58_s10 }
   0x8   :  { %s4667_s11 = smov 256   ;;  %s4668_s12 = smov 16  }
   0x9   :  { %42 = dma.hbm_to_vmem [thread:$0]  %s35_s28, 32768, %s37_s30, [#allocation6], %s4667_s11, %s4667_s11, %s4668_s12  }
   0xa   :  { %s4669_s6 = smov [#allocation8]   ;;  %s4670_s14 = smov 128  }
   0xb   :  { %s60_s13 = sshll.u32 %s4669_s6, 4  ;;  %s4671_s15 = smov 8   ;;  %s61_s13 = int_to_ptr.vmem [resolvable:$true] %s60_s13 }
   0xc   :  { %66 = dma.hbm_to_vmem [thread:$0]  %s59_s10, 8192, %s61_s13, [#allocation9], %s4670_s14, %s4670_s14, %s4671_s15  }
   0xd   :  { %s21_s17 = sshll.u32 %s4821_s0, 4  ;;  %s4672_s18 = smov [#allocation3]   ;;  %s22_s17 = int_to_ptr.hbm [resolvable:$true] %s21_s17 }
   0xe   :  { %s23_s19 = sshll.u32 %s4672_s18, 4  ;;  %s48_s21 = sshll.u32 %s4823_s2, 4  ;;  %s24_s19 = int_to_ptr.vmem [resolvable:$true] %s23_s19  ;;  %s49_s21 = int_to_ptr.hbm [resolvable:$true] %s48_s21 }
   0xf   :  { %29 = dma.hbm_to_vmem [thread:$0]  %s22_s17, 256, %s24_s19, [#allocation4], %s4667_s11, %s4667_s11, %s4668_s12  }
  0x10   :  { %s4673_s22 = smov [#allocation7]   ;;  %s73_s26 = sshll.u32 %s4826_s5, 4  ;;  %s74_s26 = int_to_ptr.hbm [resolvable:$true] %s73_s26 }
  0x11   :  { %s50_s23 = sshll.u32 %s4673_s22, 4  ;;  %s4674_s0 = smov [#allocation10]   ;;  %s51_s23 = int_to_ptr.vmem [resolvable:$true] %s50_s23 }
  0x12   :  { %53 = dma.hbm_to_vmem [thread:$0]  %s49_s21, 64, %s51_s23, [#allocation6]  }
  0x13   :  { %s75_s27 = sshll.u32 %s4674_s0, 4  ;;  %s4675_s28 = smov 64   ;;  %s76_s27 = int_to_ptr.vmem [resolvable:$true] %s75_s27 }
  0x14   :  { %s4676_s29 = smov 4  }
  0x15   :  { %81 = dma.hbm_to_vmem [thread:$0]  %s74_s26, 2048, %s76_s27, [#allocation9], %s4675_s28, %s4675_s28, %s4676_s29  }
  0x16   :  { %4660 = dma.done.wait [#allocation4], 1024  }
  0x17   :  { %4661 = vsyncadd [#allocation4], 4294966272 }
  0x18   :  { %4662 = dma.done.wait [#allocation6], 32832  }
  0x19   :  { %4663 = vsyncadd [#allocation6], 4294934464 }
  0x1a   :  { %4664 = dma.done.wait [#allocation9], 10240  }
  0x1b   :  { %4665 = vsyncadd [#allocation9], 4294957056  ;;  %v2957_v1 = vld [vmem:[#allocation5 + $0xe0] sm:$0xf]  ;;  %v4217_v2 = vld [vmem:[#allocation5 + $0xec] sm:$0xf0] }
  0x1c   :  { %v3085_v3 = vld [vmem:[#allocation5 + $0x1e0] sm:$0xf]  ;;  %v2958_v4 = vor.u32 %v4217_v2, %v2957_v1  ;;  %v4249_v5 = vld [vmem:[#allocation5 + $0x1ec] sm:$0xf0]  ;;  %vm2797_vm0 = vcmask 7168  }
  0x1d   :  { %v3213_v6 = vld [vmem:[#allocation5 + $0x2e0] sm:$0xf]  ;;  %v4281_v7 = vld [vmem:[#allocation5 + $0x2ec] sm:$0xf0]  ;;  %v3086_v8 = vor.u32 %v4249_v5, %v3085_v3 }
  0x1e   :  { %v3214_v9 = vor.u32 %v4281_v7, %v3213_v6  ;;  %v3341_v10 = vld [vmem:[#allocation5 + $0x3e0] sm:$0xf]  ;;  %v4313_v11 = vld [vmem:[#allocation5 + $0x3ec] sm:$0xf0]  ;;  %1705 = vmatpush.bf16.msra.mxu0 %v2958_v4 }
  0x1f   :  { %v2941_v12 = vld [vmem:[#allocation5 + $0xc0] sm:$0xf]  ;;  %v3342_v13 = vor.u32 %v4313_v11, %v3341_v10  ;;  %v4213_v14 = vld [vmem:[#allocation5 + $0xcc] sm:$0xf0]  ;;  %1718 = vmatpush.bf16.msra.mxu1 %v3086_v8 }
  0x20   :  { %v3069_v15 = vld [vmem:[#allocation5 + $0x1c0] sm:$0xf]  ;;  %v4245_v16 = vld [vmem:[#allocation5 + $0x1cc] sm:$0xf0]  ;;  %1731 = vmatpush.bf16.msra.mxu2 %v3214_v9  ;;  %v2942_v17 = vor.u32 %v4213_v14, %v2941_v12 }
  0x21   :  { %v3070_v18 = vor.u32 %v4245_v16, %v3069_v15  ;;  %v3197_v19 = vld [vmem:[#allocation5 + $0x2c0] sm:$0xf]  ;;  %v4277_v20 = vld [vmem:[#allocation5 + $0x2cc] sm:$0xf0]  ;;  %1744 = vmatpush.bf16.msra.mxu3 %v3342_v13 }
  0x22   :  { %v3325_v21 = vld [vmem:[#allocation5 + $0x3c0] sm:$0xf]  ;;  %v3198_v22 = vor.u32 %v4277_v20, %v3197_v19  ;;  %v4309_v23 = vld [vmem:[#allocation5 + $0x3cc] sm:$0xf0]  ;;  %1706 = vmatpush.bf16.msra.mxu0 %v2942_v17 }
  0x23   :  { %v2925_v24 = vld [vmem:[#allocation5 + $0xa0] sm:$0xf]  ;;  %v4209_v25 = vld [vmem:[#allocation5 + $0xac] sm:$0xf0]  ;;  %v3326_v26 = vor.u32 %v4309_v23, %v3325_v21  ;;  %1719 = vmatpush.bf16.msra.mxu1 %v3070_v18 }
  0x24   :  { %v3053_v27 = vld [vmem:[#allocation5 + $0x1a0] sm:$0xf]  ;;  %v4241_v28 = vld [vmem:[#allocation5 + $0x1ac] sm:$0xf0]  ;;  %v2926_v30 = vor.u32 %v4209_v25, %v2925_v24  ;;  %1732 = vmatpush.bf16.msra.mxu2 %v3198_v22 }
  0x25   :  { %v3181_v29 = vld [vmem:[#allocation5 + $0x2a0] sm:$0xf]  ;;  %v4273_v31 = vld [vmem:[#allocation5 + $0x2ac] sm:$0xf0]  ;;  %v3054_v34 = vor.u32 %v4241_v28, %v3053_v27  ;;  %1745 = vmatpush.bf16.msra.mxu3 %v3326_v26 }
  0x26   :  { %v3309_v32 = vld [vmem:[#allocation5 + $0x3a0] sm:$0xf]  ;;  %v4305_v33 = vld [vmem:[#allocation5 + $0x3ac] sm:$0xf0]  ;;  %v3182_v35 = vor.u32 %v4273_v31, %v3181_v29  ;;  %1707 = vmatpush.bf16.msra.mxu0 %v2926_v30 }
  0x27   :  { %v2909_v36 = vld [vmem:[#allocation5 + $0x80] sm:$0xf]  ;;  %v4205_v37 = vld [vmem:[#allocation5 + $0x8c] sm:$0xf0]  ;;  %v3310_v39 = vor.u32 %v4305_v33, %v3309_v32  ;;  %1720 = vmatpush.bf16.msra.mxu1 %v3054_v34 }
  0x28   :  { %v3037_v38 = vld [vmem:[#allocation5 + $0x180] sm:$0xf]  ;;  %v4237_v40 = vld [vmem:[#allocation5 + $0x18c] sm:$0xf0]  ;;  %v2910_v45 = vor.u32 %v4205_v37, %v2909_v36  ;;  %1733 = vmatpush.bf16.msra.mxu2 %v3182_v35 }
  0x29   :  { %v3165_v41 = vld [vmem:[#allocation5 + $0x280] sm:$0xf]  ;;  %v4269_v42 = vld [vmem:[#allocation5 + $0x28c] sm:$0xf0]  ;;  %v3038_v46 = vor.u32 %v4237_v40, %v3037_v38  ;;  %1746 = vmatpush.bf16.msra.mxu3 %v3310_v39 }
  0x2a   :  { %v3293_v43 = vld [vmem:[#allocation5 + $0x380] sm:$0xf]  ;;  %v4301_v44 = vld [vmem:[#allocation5 + $0x38c] sm:$0xf0]  ;;  %v3166_v47 = vor.u32 %v4269_v42, %v3165_v41  ;;  %1708 = vmatpush.bf16.msra.mxu0 %v2910_v45 }
  0x2b   :  { %v2893_v48 = vld [vmem:[#allocation5 + $0x60] sm:$0xf]  ;;  %v4201_v49 = vld [vmem:[#allocation5 + $0x6c] sm:$0xf0]  ;;  %v3294_v51 = vor.u32 %v4301_v44, %v3293_v43  ;;  %1721 = vmatpush.bf16.msra.mxu1 %v3038_v46 }
  0x2c   :  { %v3021_v50 = vld [vmem:[#allocation5 + $0x160] sm:$0xf]  ;;  %v4233_v52 = vld [vmem:[#allocation5 + $0x16c] sm:$0xf0]  ;;  %v2894_v57 = vor.u32 %v4201_v49, %v2893_v48  ;;  %1734 = vmatpush.bf16.msra.mxu2 %v3166_v47 }
  0x2d   :  { %v3149_v53 = vld [vmem:[#allocation5 + $0x260] sm:$0xf]  ;;  %v4265_v54 = vld [vmem:[#allocation5 + $0x26c] sm:$0xf0]  ;;  %v3022_v58 = vor.u32 %v4233_v52, %v3021_v50  ;;  %1747 = vmatpush.bf16.msra.mxu3 %v3294_v51 }
  0x2e   :  { %v3277_v55 = vld [vmem:[#allocation5 + $0x360] sm:$0xf]  ;;  %v4297_v56 = vld [vmem:[#allocation5 + $0x36c] sm:$0xf0]  ;;  %v3150_v59 = vor.u32 %v4265_v54, %v3149_v53  ;;  %1709 = vmatpush.bf16.msra.mxu0 %v2894_v57 }
  0x2f   :  { %v2877_v60 = vld [vmem:[#allocation5 + $0x40] sm:$0xf]  ;;  %v4197_v61 = vld [vmem:[#allocation5 + $0x4c] sm:$0xf0]  ;;  %v3278_v63 = vor.u32 %v4297_v56, %v3277_v55  ;;  %1722 = vmatpush.bf16.msra.mxu1 %v3022_v58 }
  0x30   :  { %v3005_v62 = vld [vmem:[#allocation5 + $0x140] sm:$0xf]  ;;  %v4229_v0 = vld [vmem:[#allocation5 + $0x14c] sm:$0xf0]  ;;  %v2878_v5 = vor.u32 %v4197_v61, %v2877_v60  ;;  %1735 = vmatpush.bf16.msra.mxu2 %v3150_v59 }
  0x31   :  { %v3133_v1 = vld [vmem:[#allocation5 + $0x240] sm:$0xf]  ;;  %v4261_v2 = vld [vmem:[#allocation5 + $0x24c] sm:$0xf0]  ;;  %v3006_v6 = vor.u32 %v4229_v0, %v3005_v62  ;;  %1748 = vmatpush.bf16.msra.mxu3 %v3278_v63 }
  0x32   :  { %v3261_v3 = vld [vmem:[#allocation5 + $0x340] sm:$0xf]  ;;  %v4293_v4 = vld [vmem:[#allocation5 + $0x34c] sm:$0xf0]  ;;  %v3134_v7 = vor.u32 %v4261_v2, %v3133_v1  ;;  %1710 = vmatpush.bf16.msra.mxu0 %v2878_v5 }
  0x33   :  { %v2861_v8 = vld [vmem:[#allocation5 + $0x20] sm:$0xf]  ;;  %v4193_v9 = vld [vmem:[#allocation5 + $0x2c] sm:$0xf0]  ;;  %v3262_v11 = vor.u32 %v4293_v4, %v3261_v3  ;;  %1723 = vmatpush.bf16.msra.mxu1 %v3006_v6 }
  0x34   :  { %v2989_v10 = vld [vmem:[#allocation5 + $0x120] sm:$0xf]  ;;  %v4225_v12 = vld [vmem:[#allocation5 + $0x12c] sm:$0xf0]  ;;  %v2862_v17 = vor.u32 %v4193_v9, %v2861_v8  ;;  %1736 = vmatpush.bf16.msra.mxu2 %v3134_v7 }
  0x35   :  { %v3117_v13 = vld [vmem:[#allocation5 + $0x220] sm:$0xf]  ;;  %v4257_v14 = vld [vmem:[#allocation5 + $0x22c] sm:$0xf0]  ;;  %v2990_v20 = vor.u32 %v4225_v12, %v2989_v10  ;;  %1749 = vmatpush.bf16.msra.mxu3 %v3262_v11 }
  0x36   :  { %v3245_v15 = vld [vmem:[#allocation5 + $0x320] sm:$0xf]  ;;  %v4289_v16 = vld [vmem:[#allocation5 + $0x32c] sm:$0xf0]  ;;  %v3118_v21 = vor.u32 %v4257_v14, %v3117_v13  ;;  %1711 = vmatpush.bf16.msra.mxu0 %v2862_v17 }
  0x37   :  { %v2845_v18 = vld [vmem:[#allocation5] sm:$0xf]  ;;  %v4189_v19 = vld [vmem:[#allocation5 + $0xc] sm:$0xf0]  ;;  %v3246_v25 = vor.u32 %v4289_v16, %v3245_v15  ;;  %1724 = vmatpush.bf16.msra.mxu1 %v2990_v20 }
  0x38   :  { %v2973_v22 = vld [vmem:[#allocation5 + $0x100] sm:$0xf]  ;;  %v4221_v23 = vld [vmem:[#allocation5 + $0x10c] sm:$0xf0]  ;;  %v2846_v32 = vor.u32 %v4189_v19, %v2845_v18  ;;  %1737 = vmatpush.bf16.msra.mxu2 %v3118_v21 }
  0x39   :  { %v3101_v24 = vld [vmem:[#allocation5 + $0x200] sm:$0xf]  ;;  %v4253_v26 = vld [vmem:[#allocation5 + $0x20c] sm:$0xf0]  ;;  %v2974_v36 = vor.u32 %v4221_v23, %v2973_v22  ;;  %1750 = vmatpush.bf16.msra.mxu3 %v3246_v25 }
  0x3a   :  { %v3229_v27 = vld [vmem:[#allocation5 + $0x300] sm:$0xf]  ;;  %v4285_v28 = vld [vmem:[#allocation5 + $0x30c] sm:$0xf0]  ;;  %v3102_v37 = vor.u32 %v4253_v26, %v3101_v24  ;;  %1712 = vmatpush.bf16.msra.mxu0 %v2846_v32 }
  0x3b   :  { %v3469_v29 = vld [vmem:[#allocation5 + $0x4e0] sm:$0xf]  ;;  %v4345_v30 = vld [vmem:[#allocation5 + $0x4ec] sm:$0xf0]  ;;  %v3230_v40 = vor.u32 %v4285_v28, %v3229_v27  ;;  %1725 = vmatpush.bf16.msra.mxu1 %v2974_v36 }
  0x3c   :  { %v3597_v31 = vld [vmem:[#allocation5 + $0x5e0] sm:$0xf]  ;;  %v4377_v33 = vld [vmem:[#allocation5 + $0x5ec] sm:$0xf0]  ;;  %v3470_v41 = vor.u32 %v4345_v30, %v3469_v29  ;;  %1738 = vmatpush.bf16.msra.mxu2 %v3102_v37 }
  0x3d   :  { %v3725_v34 = vld [vmem:[#allocation5 + $0x6e0] sm:$0xf]  ;;  %v4409_v35 = vld [vmem:[#allocation5 + $0x6ec] sm:$0xf0]  ;;  %v3598_v42 = vor.u32 %v4377_v33, %v3597_v31  ;;  %1751 = vmatpush.bf16.msra.mxu3 %v3230_v40 }
  0x3e   :  { %v3853_v38 = vld [vmem:[#allocation5 + $0x7e0] sm:$0xf]  ;;  %v4441_v39 = vld [vmem:[#allocation5 + $0x7ec] sm:$0xf0]  ;;  %v3726_v43 = vor.u32 %v4409_v35, %v3725_v34  ;;  %1757 = vmatpush.bf16.msrb.mxu0 %v3470_v41 }
  0x3f   :  { %v3453_v44 = vld [vmem:[#allocation5 + $0x4c0] sm:$0xf]  ;;  %v4341_v45 = vld [vmem:[#allocation5 + $0x4cc] sm:$0xf0]  ;;  %v3854_v47 = vor.u32 %v4441_v39, %v3853_v38  ;;  %1770 = vmatpush.bf16.msrb.mxu1 %v3598_v42 }
  0x40   :  { %v3581_v46 = vld [vmem:[#allocation5 + $0x5c0] sm:$0xf]  ;;  %v4373_v48 = vld [vmem:[#allocation5 + $0x5cc] sm:$0xf0]  ;;  %v3454_v54 = vor.u32 %v4341_v45, %v3453_v44  ;;  %1783 = vmatpush.bf16.msrb.mxu2 %v3726_v43 }
  0x41   :  { %v3709_v49 = vld [vmem:[#allocation5 + $0x6c0] sm:$0xf]  ;;  %v4405_v50 = vld [vmem:[#allocation5 + $0x6cc] sm:$0xf0]  ;;  %v3582_v58 = vor.u32 %v4373_v48, %v3581_v46  ;;  %1796 = vmatpush.bf16.msrb.mxu3 %v3854_v47 }
  0x42   :  { %v3837_v51 = vld [vmem:[#allocation5 + $0x7c0] sm:$0xf]  ;;  %v4437_v52 = vld [vmem:[#allocation5 + $0x7cc] sm:$0xf0]  ;;  %v3710_v59 = vor.u32 %v4405_v50, %v3709_v49  ;;  %1758 = vmatpush.bf16.msrb.mxu0 %v3454_v54 }
  0x43   :  { %v3437_v53 = vld [vmem:[#allocation5 + $0x4a0] sm:$0xf]  ;;  %v4337_v55 = vld [vmem:[#allocation5 + $0x4ac] sm:$0xf0]  ;;  %v3838_v63 = vor.u32 %v4437_v52, %v3837_v51  ;;  %1771 = vmatpush.bf16.msrb.mxu1 %v3582_v58 }
  0x44   :  { %v3565_v56 = vld [vmem:[#allocation5 + $0x5a0] sm:$0xf]  ;;  %v4369_v57 = vld [vmem:[#allocation5 + $0x5ac] sm:$0xf0]  ;;  %v3438_v5 = vor.u32 %v4337_v55, %v3437_v53  ;;  %1784 = vmatpush.bf16.msrb.mxu2 %v3710_v59 }
  0x45   :  { %v3693_v60 = vld [vmem:[#allocation5 + $0x6a0] sm:$0xf]  ;;  %v4401_v61 = vld [vmem:[#allocation5 + $0x6ac] sm:$0xf0]  ;;  %v3566_v7 = vor.u32 %v4369_v57, %v3565_v56  ;;  %1797 = vmatpush.bf16.msrb.mxu3 %v3838_v63  ;;  %v105_v63 = vld [vmem:[#allocation3 + $0x8] sm:$0xff] }
  0x46   :  { %v104_v62 = vld [vmem:[#allocation3] sm:$0xff]  ;;  %v106_v0 = vld [vmem:[#allocation3 + $0x10] sm:$0xff]  ;;  %v3694_v8 = vor.u32 %v4401_v61, %v3693_v60  ;;  %1759 = vmatpush.bf16.msrb.mxu0 %v3438_v5  ;;  %v109_v5 = vld [vmem:[#allocation3 + $0x28] sm:$0xff]  ;;  %128 = vst [vmem:[#allocation1 + $0x20] ss:$4 sm:$0xff] %v105_v63 }
  0x47   :  { %v108_v1 = vld [vmem:[#allocation3 + $0x20] sm:$0xff]  ;;  %v110_v2 = vld [vmem:[#allocation3 + $0x30] sm:$0xff]  ;;  %120 = vst [vmem:[#allocation1] ss:$4 sm:$0xff] %v104_v62  ;;  %1772 = vmatpush.bf16.msrb.mxu1 %v3566_v7 }
  0x48   :  { %v3821_v3 = vld [vmem:[#allocation5 + $0x7a0] sm:$0xf]  ;;  %v4433_v4 = vld [vmem:[#allocation5 + $0x7ac] sm:$0xf0]  ;;  %122 = vst [vmem:[#allocation1 + $0x1] ss:$4 sm:$0xff] %v106_v0  ;;  %1785 = vmatpush.bf16.msrb.mxu2 %v3694_v8 }
  0x49   :  { %v3421_v6 = vld [vmem:[#allocation5 + $0x480] sm:$0xf]  ;;  %124 = vst [vmem:[#allocation1 + $0x2] ss:$4 sm:$0xff] %v108_v1  ;;  %v4333_v9 = vld [vmem:[#allocation5 + $0x48c] sm:$0xf0]  ;;  %v3822_v11 = vor.u32 %v4433_v4, %v3821_v3 }
  0x4a   :  { %v3549_v10 = vld [vmem:[#allocation5 + $0x580] sm:$0xf]  ;;  %126 = vst [vmem:[#allocation1 + $0x3] ss:$4 sm:$0xff] %v110_v2  ;;  %v4365_v12 = vld [vmem:[#allocation5 + $0x58c] sm:$0xf0]  ;;  %v3422_v17 = vor.u32 %v4333_v9, %v3421_v6 }
  0x4b   :  { %v3677_v13 = vld [vmem:[#allocation5 + $0x680] sm:$0xf]  ;;  %v4397_v14 = vld [vmem:[#allocation5 + $0x68c] sm:$0xf0]  ;;  %v3550_v19 = vor.u32 %v4365_v12, %v3549_v10  ;;  %1798 = vmatpush.bf16.msrb.mxu3 %v3822_v11  ;;  %v107_v0 = vld [vmem:[#allocation3 + $0x18] sm:$0xff] }
  0x4c   :  { %v3805_v15 = vld [vmem:[#allocation5 + $0x780] sm:$0xf]  ;;  %v4429_v16 = vld [vmem:[#allocation5 + $0x78c] sm:$0xf0]  ;;  %v3678_v20 = vor.u32 %v4397_v14, %v3677_v13  ;;  %1760 = vmatpush.bf16.msrb.mxu0 %v3422_v17  ;;  %v111_v6 = vld [vmem:[#allocation3 + $0x38] sm:$0xff] }
  0x4d   :  { %v3405_v18 = vld [vmem:[#allocation5 + $0x460] sm:$0xf]  ;;  %v4329_v21 = vld [vmem:[#allocation5 + $0x46c] sm:$0xf0]  ;;  %v3806_v24 = vor.u32 %v4429_v16, %v3805_v15  ;;  %1773 = vmatpush.bf16.msrb.mxu1 %v3550_v19  ;;  %130 = vst [vmem:[#allocation1 + $0x21] ss:$4 sm:$0xff] %v107_v0 }
  0x4e   :  { %v3533_v22 = vld [vmem:[#allocation5 + $0x560] sm:$0xf]  ;;  %v4361_v23 = vld [vmem:[#allocation5 + $0x56c] sm:$0xf0]  ;;  %v3406_v31 = vor.u32 %v4329_v21, %v3405_v18  ;;  %1786 = vmatpush.bf16.msrb.mxu2 %v3678_v20  ;;  %v4215_v13 = vld [vmem:[#allocation5 + $0xe4] sm:$0xf] }
  0x4f   :  { %v3661_v25 = vld [vmem:[#allocation5 + $0x660] sm:$0xf]  ;;  %v4393_v26 = vld [vmem:[#allocation5 + $0x66c] sm:$0xf0]  ;;  %v3534_v32 = vor.u32 %v4361_v23, %v3533_v22  ;;  %1799 = vmatpush.bf16.msrb.mxu3 %v3806_v24  ;;  %132 = vst [vmem:[#allocation1 + $0x22] ss:$4 sm:$0xff] %v109_v5 }
  0x50   :  { %v3789_v27 = vld [vmem:[#allocation5 + $0x760] sm:$0xf]  ;;  %v4425_v28 = vld [vmem:[#allocation5 + $0x76c] sm:$0xf0]  ;;  %v3662_v36 = vor.u32 %v4393_v26, %v3661_v25  ;;  %1761 = vmatpush.bf16.msrb.mxu0 %v3406_v31  ;;  %v2959_v14 = vld [vmem:[#allocation5 + $0xf0] sm:$0xf0] }
  0x51   :  { %v3389_v29 = vld [vmem:[#allocation5 + $0x440] sm:$0xf]  ;;  %v4325_v30 = vld [vmem:[#allocation5 + $0x44c] sm:$0xf0]  ;;  %v3790_v41 = vor.u32 %v4425_v28, %v3789_v27  ;;  %1774 = vmatpush.bf16.msrb.mxu1 %v3534_v32  ;;  %v4247_v15 = vld [vmem:[#allocation5 + $0x1e4] sm:$0xf]  ;;  %v2962_v25 = vor.u32 %v4215_v13, %v2959_v14 }
  0x52   :  { %v137_v33 = vld.sshfl [vmem:[#allocation1 + $0x10] sm:$0xff pattern:$0x73625140]  ;;  %v3517_v34 = vld [vmem:[#allocation5 + $0x540] sm:$0xf]  ;;  %v3390_v49 = vor.u32 %v4325_v30, %v3389_v29  ;;  %1787 = vmatpush.bf16.msrb.mxu2 %v3662_v36 }
  0x53   :  { %v135_v35 = vld.sshfl [vmem:[#allocation1] sm:$0xff pattern:$0x73625140]  ;;  %v4735_v37 = vpack.c.bf16 %v137_v33, %v137_v33  ;;  %v138_v39 = vld.sshfl [vmem:[#allocation1 + $0x18] sm:$0xff pattern:$0x73625140]  ;;  %1800 = vmatpush.bf16.msrb.mxu3 %v3790_v41 }
  0x54   :  { %v4737_v38 = vpack.c.bf16 %v135_v35, %v135_v35  ;;  %v136_v40 = vld.sshfl [vmem:[#allocation1 + $0x8] sm:$0xff pattern:$0x73625140]  ;;  %v4357_v42 = vld [vmem:[#allocation5 + $0x54c] sm:$0xf0]  ;;  %v4739_v45 = vpack.c.bf16 %v138_v39, %v138_v39  ;;  %1762 = vmatpush.bf16.msrb.mxu0 %v3390_v49 }
  0x55   :  { %v3645_v43 = vld [vmem:[#allocation5 + $0x640] sm:$0xf]  ;;  %v4389_v44 = vld [vmem:[#allocation5 + $0x64c] sm:$0xf0]  ;;  %v4741_v46 = vpack.c.bf16 %v136_v40, %v136_v40  ;;  %1739 = vmatmul.bf16.vlgmr.msra.gmra.mxu2 %v4735_v37  ;;  %v3518_v52 = vor.u32 %v4357_v42, %v3517_v34  ;;  %134 = vst [vmem:[#allocation1 + $0x23] ss:$4 sm:$0xff] %v111_v6 }
  0x56   :  { %v3773_v47 = vld [vmem:[#allocation5 + $0x740] sm:$0xf]  ;;  %v4421_v48 = vld [vmem:[#allocation5 + $0x74c] sm:$0xf0]  ;;  %1713 = vmatmul.bf16.vlgmr.msra.gmra.mxu0 %v4737_v38  ;;  %1752 = vmatmul.bf16.vlgmr.msra.gmra.mxu3 %v4739_v45  ;;  %v3646_v53 = vor.u32 %v4389_v44, %v3645_v43  ;;  %v3087_v17 = vld [vmem:[#allocation5 + $0x1f0] sm:$0xf0] }
  0x57   :  { %v3373_v50 = vld [vmem:[#allocation5 + $0x420] sm:$0xf]  ;;  %v4321_v51 = vld [vmem:[#allocation5 + $0x42c] sm:$0xf0]  ;;  %v3774_v57 = vor.u32 %v4421_v48, %v3773_v47  ;;  %1726 = vmatmul.bf16.vlgmr.msra.gmra.mxu1 %v4741_v46  ;;  %v4279_v18 = vld [vmem:[#allocation5 + $0x2e4] sm:$0xf]  ;;  %v3090_v27 = vor.u32 %v4247_v15, %v3087_v17 }
  0x58   :  { %v3501_v54 = vld [vmem:[#allocation5 + $0x520] sm:$0xf]  ;;  %v4353_v55 = vld [vmem:[#allocation5 + $0x52c] sm:$0xf0]  ;;  %v3374_v1 = vor.u32 %v4321_v51, %v3373_v50  ;;  %1775 = vmatpush.bf16.msrb.mxu1 %v3518_v52  ;;  %1788 = vmatpush.bf16.msrb.mxu2 %v3646_v53  ;;  %v3215_v19 = vld [vmem:[#allocation5 + $0x2f0] sm:$0xf0] }
  0x59   :  { %v3629_v56 = vld [vmem:[#allocation5 + $0x620] sm:$0xf]  ;;  %v4385_v58 = vld [vmem:[#allocation5 + $0x62c] sm:$0xf0]  ;;  %v3502_v7 = vor.u32 %v4353_v55, %v3501_v54  ;;  %1801 = vmatpush.bf16.msrb.mxu3 %v3774_v57  ;;  %v4311_v22 = vld [vmem:[#allocation5 + $0x3e4] sm:$0xf]  ;;  %v3218_v28 = vor.u32 %v4279_v18, %v3215_v19 }
  0x5a   :  { %v3757_v59 = vld [vmem:[#allocation5 + $0x720] sm:$0xf]  ;;  %v4417_v60 = vld [vmem:[#allocation5 + $0x72c] sm:$0xf0]  ;;  %v3630_v8 = vor.u32 %v4385_v58, %v3629_v56  ;;  %1763 = vmatpush.bf16.msrb.mxu0 %v3374_v1  ;;  %v3343_v23 = vld [vmem:[#allocation5 + $0x3f0] sm:$0xf0] }
  0x5b   :  { %v3357_v61 = vld [vmem:[#allocation5 + $0x400] sm:$0xf]  ;;  %v4317_v62 = vld [vmem:[#allocation5 + $0x40c] sm:$0xf0]  ;;  %v3758_v11 = vor.u32 %v4417_v60, %v3757_v59  ;;  %v4211_v26 = vld [vmem:[#allocation5 + $0xc4] sm:$0xf]  ;;  %v3346_v32 = vor.u32 %v4311_v22, %v3343_v23 }
  0x5c   :  { %v3485_v2 = vld [vmem:[#allocation5 + $0x500] sm:$0xf]  ;;  %v4349_v3 = vld [vmem:[#allocation5 + $0x50c] sm:$0xf0]  ;;  %v3358_v16 = vor.u32 %v4317_v62, %v3357_v61  ;;  %1776 = vmatpush.bf16.msrb.mxu1 %v3502_v7  ;;  %1789 = vmatpush.bf16.msrb.mxu2 %v3630_v8  ;;  %v2943_v29 = vld [vmem:[#allocation5 + $0xd0] sm:$0xf0] }
  0x5d   :  { %v3613_v4 = vld [vmem:[#allocation5 + $0x600] sm:$0xf]  ;;  %v4381_v9 = vld [vmem:[#allocation5 + $0x60c] sm:$0xf0]  ;;  %v3486_v20 = vor.u32 %v4349_v3, %v3485_v2  ;;  %1802 = vmatpush.bf16.msrb.mxu3 %v3758_v11  ;;  %v4243_v30 = vld [vmem:[#allocation5 + $0x1c4] sm:$0xf]  ;;  %v2946_v41 = vor.u32 %v4211_v26, %v2943_v29 }
  0x5e   :  { %v3741_v10 = vld [vmem:[#allocation5 + $0x700] sm:$0xf]  ;;  %v4413_v12 = vld [vmem:[#allocation5 + $0x70c] sm:$0xf0]  ;;  %v3614_v21 = vor.u32 %v4381_v9, %v3613_v4  ;;  %v3071_v31 = vld [vmem:[#allocation5 + $0x1d0] sm:$0xf0]  ;;  %1764 = vmatpush.bf16.msrb.mxu0 %v3358_v16 }
  0x5f   :  { %v3742_v24 = vor.u32 %v4413_v12, %v3741_v10  ;;  %v4275_v33 = vld [vmem:[#allocation5 + $0x2c4] sm:$0xf]  ;;  %v3199_v34 = vld [vmem:[#allocation5 + $0x2d0] sm:$0xf0]  ;;  %v3074_v42 = vor.u32 %v4243_v30, %v3071_v31 }
  0x60   :  { %v4307_v35 = vld [vmem:[#allocation5 + $0x3c4] sm:$0xf]  ;;  %1777 = vmatpush.bf16.msrb.mxu1 %v3486_v20  ;;  %1790 = vmatpush.bf16.msrb.mxu2 %v3614_v21  ;;  %v3327_v36 = vld [vmem:[#allocation5 + $0x3d0] sm:$0xf0]  ;;  %v3202_v48 = vor.u32 %v4275_v33, %v3199_v34 }
  0x61   :  { %v4207_v39 = vld [vmem:[#allocation5 + $0xa4] sm:$0xf]  ;;  %v2927_v40 = vld [vmem:[#allocation5 + $0xb0] sm:$0xf0]  ;;  %1803 = vmatpush.bf16.msrb.mxu3 %v3742_v24  ;;  %v3330_v53 = vor.u32 %v4307_v35, %v3327_v36 }
  0x62   :  { %1809 = vmatpush.bf16.msra.mxu0 %v2962_v25  ;;  %v141_v43 = vld.sshfl [vmem:[#allocation1 + $0x30] sm:$0xff pattern:$0x73625140]  ;;  %v139_v44 = vld.sshfl [vmem:[#allocation1 + $0x20] sm:$0xff pattern:$0x73625140]  ;;  %v2930_v61 = vor.u32 %v4207_v39, %v2927_v40 }
  0x63   :  { %v4239_v47 = vld [vmem:[#allocation5 + $0x1a4] sm:$0xf]  ;;  %v4747_v49 = vpack.c.bf16 %v141_v43, %v141_v43  ;;  %v4749_v50 = vpack.c.bf16 %v139_v44, %v139_v44  ;;  %v142_v51 = vld.sshfl [vmem:[#allocation1 + $0x38] sm:$0xff pattern:$0x73625140] }
  0x64   :  { %1822 = vmatpush.bf16.msra.mxu1 %v3090_v27  ;;  %1835 = vmatpush.bf16.msra.mxu2 %v3218_v28  ;;  %v140_v52 = vld.sshfl [vmem:[#allocation1 + $0x28] sm:$0xff pattern:$0x73625140]  ;;  %v4751_v54 = vpack.c.bf16 %v142_v51, %v142_v51  ;;  %v3055_v55 = vld [vmem:[#allocation5 + $0x1b0] sm:$0xf0] }
  0x65   :  { %1848 = vmatpush.bf16.msra.mxu3 %v3346_v32  ;;  %v4271_v56 = vld [vmem:[#allocation5 + $0x2a4] sm:$0xf]  ;;  %v3183_v57 = vld [vmem:[#allocation5 + $0x2b0] sm:$0xf0]  ;;  %v4753_v58 = vpack.c.bf16 %v140_v52, %v140_v52  ;;  %1791 = vmatmul.bf16.vlgmr.msrb.gmra.mxu2 %v4747_v49  ;;  %v3058_v62 = vor.u32 %v4239_v47, %v3055_v55 }
  0x66   :  { %1765 = vmatmul.bf16.vlgmr.msrb.gmra.mxu0 %v4749_v50  ;;  %v4303_v59 = vld [vmem:[#allocation5 + $0x3a4] sm:$0xf]  ;;  %v3311_v60 = vld [vmem:[#allocation5 + $0x3b0] sm:$0xf0]  ;;  %1804 = vmatmul.bf16.vlgmr.msrb.gmra.mxu3 %v4751_v54  ;;  %v3186_v63 = vor.u32 %v4271_v56, %v3183_v57 }
  0x67   :  { %1810 = vmatpush.bf16.msra.mxu0 %v2946_v41  ;;  %v4203_v0 = vld [vmem:[#allocation5 + $0x84] sm:$0xf]  ;;  %v2911_v1 = vld [vmem:[#allocation5 + $0x90] sm:$0xf0]  ;;  %v3314_v3 = vor.u32 %v4303_v59, %v3311_v60  ;;  %1778 = vmatmul.bf16.vlgmr.msrb.gmra.mxu1 %v4753_v58 }
  0x68   :  { %1823 = vmatpush.bf16.msra.mxu1 %v3074_v42  ;;  %1836 = vmatpush.bf16.msra.mxu2 %v3202_v48  ;;  %v4235_v2 = vld [vmem:[#allocation5 + $0x184] sm:$0xf]  ;;  %v3039_v4 = vld [vmem:[#allocation5 + $0x190] sm:$0xf0]  ;;  %v2914_v9 = vor.u32 %v4203_v0, %v2911_v1 }
  0x69   :  { %1849 = vmatpush.bf16.msra.mxu3 %v3330_v53  ;;  %v4267_v5 = vld [vmem:[#allocation5 + $0x284] sm:$0xf]  ;;  %v3167_v6 = vld [vmem:[#allocation5 + $0x290] sm:$0xf0]  ;;  %v3042_v10 = vor.u32 %v4235_v2, %v3039_v4 }
  0x6a   :  { %v4299_v7 = vld [vmem:[#allocation5 + $0x384] sm:$0xf]  ;;  %v3295_v8 = vld [vmem:[#allocation5 + $0x390] sm:$0xf0]  ;;  %v3170_v11 = vor.u32 %v4267_v5, %v3167_v6 }
  0x6b   :  { %1811 = vmatpush.bf16.msra.mxu0 %v2930_v61  ;;  %v4199_v12 = vld [vmem:[#allocation5 + $0x64] sm:$0xf]  ;;  %v2895_v13 = vld [vmem:[#allocation5 + $0x70] sm:$0xf0]  ;;  %v3298_v15 = vor.u32 %v4299_v7, %v3295_v8 }
  0x6c   :  { %1824 = vmatpush.bf16.msra.mxu1 %v3058_v62  ;;  %1837 = vmatpush.bf16.msra.mxu2 %v3186_v63  ;;  %v4231_v14 = vld [vmem:[#allocation5 + $0x164] sm:$0xf]  ;;  %v3023_v16 = vld [vmem:[#allocation5 + $0x170] sm:$0xf0]  ;;  %v2898_v21 = vor.u32 %v4199_v12, %v2895_v13 }
  0x6d   :  { %1850 = vmatpush.bf16.msra.mxu3 %v3314_v3  ;;  %v4263_v17 = vld [vmem:[#allocation5 + $0x264] sm:$0xf]  ;;  %v3151_v18 = vld [vmem:[#allocation5 + $0x270] sm:$0xf0]  ;;  %v3026_v22 = vor.u32 %v4231_v14, %v3023_v16 }
  0x6e   :  { %v4295_v19 = vld [vmem:[#allocation5 + $0x364] sm:$0xf]  ;;  %v3279_v20 = vld [vmem:[#allocation5 + $0x370] sm:$0xf0]  ;;  %v3154_v23 = vor.u32 %v4263_v17, %v3151_v18 }
  0x6f   :  { %1812 = vmatpush.bf16.msra.mxu0 %v2914_v9  ;;  %v4195_v24 = vld [vmem:[#allocation5 + $0x44] sm:$0xf]  ;;  %v2879_v25 = vld [vmem:[#allocation5 + $0x50] sm:$0xf0]  ;;  %v3282_v27 = vor.u32 %v4295_v19, %v3279_v20 }
  0x70   :  { %1825 = vmatpush.bf16.msra.mxu1 %v3042_v10  ;;  %1838 = vmatpush.bf16.msra.mxu2 %v3170_v11  ;;  %v4227_v26 = vld [vmem:[#allocation5 + $0x144] sm:$0xf]  ;;  %v3007_v28 = vld [vmem:[#allocation5 + $0x150] sm:$0xf0]  ;;  %v2882_v33 = vor.u32 %v4195_v24, %v2879_v25 }
  0x71   :  { %1851 = vmatpush.bf16.msra.mxu3 %v3298_v15  ;;  %v4259_v29 = vld [vmem:[#allocation5 + $0x244] sm:$0xf]  ;;  %v3135_v30 = vld [vmem:[#allocation5 + $0x250] sm:$0xf0]  ;;  %v3010_v34 = vor.u32 %v4227_v26, %v3007_v28 }
  0x72   :  { %v4291_v31 = vld [vmem:[#allocation5 + $0x344] sm:$0xf]  ;;  %v3263_v32 = vld [vmem:[#allocation5 + $0x350] sm:$0xf0]  ;;  %v3138_v35 = vor.u32 %v4259_v29, %v3135_v30 }
  0x73   :  { %1813 = vmatpush.bf16.msra.mxu0 %v2898_v21  ;;  %v4191_v36 = vld [vmem:[#allocation5 + $0x24] sm:$0xf]  ;;  %v2863_v39 = vld [vmem:[#allocation5 + $0x30] sm:$0xf0]  ;;  %v3266_v41 = vor.u32 %v4291_v31, %v3263_v32 }
  0x74   :  { %1826 = vmatpush.bf16.msra.mxu1 %v3026_v22  ;;  %1839 = vmatpush.bf16.msra.mxu2 %v3154_v23  ;;  %v4223_v40 = vld [vmem:[#allocation5 + $0x124] sm:$0xf]  ;;  %v2991_v42 = vld [vmem:[#allocation5 + $0x130] sm:$0xf0]  ;;  %v2866_v51 = vor.u32 %v4191_v36, %v2863_v39 }
  0x75   :  { %1852 = vmatpush.bf16.msra.mxu3 %v3282_v27  ;;  %v4255_v43 = vld [vmem:[#allocation5 + $0x224] sm:$0xf]  ;;  %v3119_v44 = vld [vmem:[#allocation5 + $0x230] sm:$0xf0]  ;;  %v2994_v55 = vor.u32 %v4223_v40, %v2991_v42 }
  0x76   :  { %v4287_v47 = vld [vmem:[#allocation5 + $0x324] sm:$0xf]  ;;  %v3247_v48 = vld [vmem:[#allocation5 + $0x330] sm:$0xf0]  ;;  %v3122_v56 = vor.u32 %v4255_v43, %v3119_v44 }
  0x77   :  { %1814 = vmatpush.bf16.msra.mxu0 %v2882_v33  ;;  %v4187_v52 = vld [vmem:[#allocation5 + $0x4] sm:$0xf]  ;;  %v2847_v53 = vld [vmem:[#allocation5 + $0x10] sm:$0xf0]  ;;  %v3250_v61 = vor.u32 %v4287_v47, %v3247_v48 }
  0x78   :  { %1827 = vmatpush.bf16.msra.mxu1 %v3010_v34  ;;  %1840 = vmatpush.bf16.msra.mxu2 %v3138_v35  ;;  %v4219_v57 = vld [vmem:[#allocation5 + $0x104] sm:$0xf]  ;;  %v2975_v59 = vld [vmem:[#allocation5 + $0x110] sm:$0xf0]  ;;  %v2850_v4 = vor.u32 %v4187_v52, %v2847_v53 }
  0x79   :  { %v4251_v60 = vld [vmem:[#allocation5 + $0x204] sm:$0xf]  ;;  %1853 = vmatpush.bf16.msra.mxu3 %v3266_v41  ;;  %v3103_v62 = vld [vmem:[#allocation5 + $0x210] sm:$0xf0]  ;;  %v2978_v8 = vor.u32 %v4219_v57, %v2975_v59 }
  0x7a   :  { %v4283_v63 = vld [vmem:[#allocation5 + $0x304] sm:$0xf]  ;;  %v3231_v0 = vld [vmem:[#allocation5 + $0x310] sm:$0xf0]  ;;  %v3106_v9 = vor.u32 %v4251_v60, %v3103_v62 }
  0x7b   :  { %v4343_v1 = vld [vmem:[#allocation5 + $0x4e4] sm:$0xf]  ;;  %v3471_v2 = vld [vmem:[#allocation5 + $0x4f0] sm:$0xf0]  ;;  %1815 = vmatpush.bf16.msra.mxu0 %v2866_v51  ;;  %v3234_v12 = vor.u32 %v4283_v63, %v3231_v0 }
  0x7c   :  { %v4375_v3 = vld [vmem:[#allocation5 + $0x5e4] sm:$0xf]  ;;  %v3599_v5 = vld [vmem:[#allocation5 + $0x5f0] sm:$0xf0]  ;;  %1828 = vmatpush.bf16.msra.mxu1 %v2994_v55  ;;  %1841 = vmatpush.bf16.msra.mxu2 %v3122_v56  ;;  %v3474_v13 = vor.u32 %v4343_v1, %v3471_v2 }
  0x7d   :  { %v4407_v6 = vld [vmem:[#allocation5 + $0x6e4] sm:$0xf]  ;;  %v3727_v7 = vld [vmem:[#allocation5 + $0x6f0] sm:$0xf0]  ;;  %1854 = vmatpush.bf16.msra.mxu3 %v3250_v61  ;;  %v3602_v14 = vor.u32 %v4375_v3, %v3599_v5 }
  0x7e   :  { %v4439_v10 = vld [vmem:[#allocation5 + $0x7e4] sm:$0xf]  ;;  %v3855_v11 = vld [vmem:[#allocation5 + $0x7f0] sm:$0xf0]  ;;  %v3730_v15 = vor.u32 %v4407_v6, %v3727_v7 }
  0x7f   :  { %v4339_v16 = vld [vmem:[#allocation5 + $0x4c4] sm:$0xf]  ;;  %v3455_v17 = vld [vmem:[#allocation5 + $0x4d0] sm:$0xf0]  ;;  %1816 = vmatpush.bf16.msra.mxu0 %v2850_v4  ;;  %v3858_v19 = vor.u32 %v4439_v10, %v3855_v11 }
  0x80   :  { %v4371_v18 = vld [vmem:[#allocation5 + $0x5c4] sm:$0xf]  ;;  %v3583_v20 = vld [vmem:[#allocation5 + $0x5d0] sm:$0xf0]  ;;  %1829 = vmatpush.bf16.msra.mxu1 %v2978_v8  ;;  %1842 = vmatpush.bf16.msra.mxu2 %v3106_v9  ;;  %v3458_v25 = vor.u32 %v4339_v16, %v3455_v17 }
  0x81   :  { %v4403_v21 = vld [vmem:[#allocation5 + $0x6c4] sm:$0xf]  ;;  %v3711_v22 = vld [vmem:[#allocation5 + $0x6d0] sm:$0xf0]  ;;  %1855 = vmatpush.bf16.msra.mxu3 %v3234_v12  ;;  %v3586_v26 = vor.u32 %v4371_v18, %v3583_v20 }
  0x82   :  { %v4435_v23 = vld [vmem:[#allocation5 + $0x7c4] sm:$0xf]  ;;  %v3839_v24 = vld [vmem:[#allocation5 + $0x7d0] sm:$0xf0]  ;;  %v3714_v27 = vor.u32 %v4403_v21, %v3711_v22  ;;  %1817 = vmatmul.bf16.vlgmr.msra.gmra.mxu0 %v4737_v38 }
  0x83   :  { %1861 = vmatpush.bf16.msrb.mxu0 %v3474_v13  ;;  %v4335_v28 = vld [vmem:[#allocation5 + $0x4a4] sm:$0xf]  ;;  %v3439_v29 = vld [vmem:[#allocation5 + $0x4b0] sm:$0xf0]  ;;  %v3842_v31 = vor.u32 %v4435_v23, %v3839_v24  ;;  %1843 = vmatmul.bf16.vlgmr.msra.gmra.mxu2 %v4735_v37 }
  0x84   :  { %1874 = vmatpush.bf16.msrb.mxu1 %v3602_v14  ;;  %1887 = vmatpush.bf16.msrb.mxu2 %v3730_v15  ;;  %v4367_v30 = vld [vmem:[#allocation5 + $0x5a4] sm:$0xf]  ;;  %v3567_v32 = vld [vmem:[#allocation5 + $0x5b0] sm:$0xf0]  ;;  %v3442_v39 = vor.u32 %v4335_v28, %v3439_v29 }
  0x85   :  { %1900 = vmatpush.bf16.msrb.mxu3 %v3858_v19  ;;  %v4399_v33 = vld [vmem:[#allocation5 + $0x6a4] sm:$0xf]  ;;  %v3695_v34 = vld [vmem:[#allocation5 + $0x6b0] sm:$0xf0]  ;;  %1830 = vmatmul.bf16.vlgmr.msra.gmra.mxu1 %v4741_v46  ;;  %v3570_v40 = vor.u32 %v4367_v30, %v3567_v32 }
  0x86   :  { %v4431_v35 = vld [vmem:[#allocation5 + $0x7a4] sm:$0xf]  ;;  %v3823_v36 = vld [vmem:[#allocation5 + $0x7b0] sm:$0xf0]  ;;  %1856 = vmatmul.bf16.vlgmr.msra.gmra.mxu3 %v4739_v45  ;;  %v3698_v41 = vor.u32 %v4399_v33, %v3695_v34 }
  0x87   :  { %1862 = vmatpush.bf16.msrb.mxu0 %v3458_v25  ;;  %v4331_v42 = vld [vmem:[#allocation5 + $0x484] sm:$0xf]  ;;  %v3423_v43 = vld [vmem:[#allocation5 + $0x490] sm:$0xf0]  ;;  %v3826_v47 = vor.u32 %v4431_v35, %v3823_v36 }
  0x88   :  { %1875 = vmatpush.bf16.msrb.mxu1 %v3586_v26  ;;  %1888 = vmatpush.bf16.msrb.mxu2 %v3714_v27  ;;  %v4363_v44 = vld [vmem:[#allocation5 + $0x584] sm:$0xf]  ;;  %v3551_v48 = vld [vmem:[#allocation5 + $0x590] sm:$0xf0]  ;;  %v3426_v56 = vor.u32 %v4331_v42, %v3423_v43  ;;  %v2965_v43 = vld [vmem:[#allocation5 + $0xe8] sm:$0xf] }
  0x89   :  { %1901 = vmatpush.bf16.msrb.mxu3 %v3842_v31  ;;  %v4395_v51 = vld [vmem:[#allocation5 + $0x684] sm:$0xf]  ;;  %v3679_v52 = vld [vmem:[#allocation5 + $0x690] sm:$0xf0]  ;;  %v3554_v57 = vor.u32 %v4363_v44, %v3551_v48  ;;  %v4218_v44 = vld [vmem:[#allocation5 + $0xf4] sm:$0xf0] }
  0x8a   :  { %v4427_v53 = vld [vmem:[#allocation5 + $0x784] sm:$0xf]  ;;  %v3807_v55 = vld [vmem:[#allocation5 + $0x790] sm:$0xf0]  ;;  %v3682_v59 = vor.u32 %v4395_v51, %v3679_v52  ;;  %v4250_v51 = vld [vmem:[#allocation5 + $0x1f4] sm:$0xf0] }
  0x8b   :  { %1863 = vmatpush.bf16.msrb.mxu0 %v3442_v39  ;;  %v4327_v60 = vld [vmem:[#allocation5 + $0x464] sm:$0xf]  ;;  %v3407_v61 = vld [vmem:[#allocation5 + $0x470] sm:$0xf0]  ;;  %v3810_v63 = vor.u32 %v4427_v53, %v3807_v55  ;;  %v3221_v52 = vld [vmem:[#allocation5 + $0x2e8] sm:$0xf] }
  0x8c   :  { %1876 = vmatpush.bf16.msrb.mxu1 %v3570_v40  ;;  %1889 = vmatpush.bf16.msrb.mxu2 %v3698_v41  ;;  %v4359_v62 = vld [vmem:[#allocation5 + $0x564] sm:$0xf]  ;;  %v3535_v0 = vld [vmem:[#allocation5 + $0x570] sm:$0xf0]  ;;  %v3410_v5 = vor.u32 %v4327_v60, %v3407_v61  ;;  %v4282_v53 = vld [vmem:[#allocation5 + $0x2f4] sm:$0xf0]  ;;  %v2966_v61 = vor.u32 %v4218_v44, %v2965_v43 }
  0x8d   :  { %1902 = vmatpush.bf16.msrb.mxu3 %v3826_v47  ;;  %v4391_v1 = vld [vmem:[#allocation5 + $0x664] sm:$0xf]  ;;  %v3663_v2 = vld [vmem:[#allocation5 + $0x670] sm:$0xf0]  ;;  %v3538_v6 = vor.u32 %v4359_v62, %v3535_v0  ;;  %v3093_v47 = vld [vmem:[#allocation5 + $0x1e8] sm:$0xf] }
  0x8e   :  { %v4423_v3 = vld [vmem:[#allocation5 + $0x764] sm:$0xf]  ;;  %v3791_v4 = vld [vmem:[#allocation5 + $0x770] sm:$0xf0]  ;;  %v3666_v7 = vor.u32 %v4391_v1, %v3663_v2  ;;  %v3094_v62 = vor.u32 %v4250_v51, %v3093_v47  ;;  %v2949_v0 = vld [vmem:[#allocation5 + $0xc8] sm:$0xf] }
  0x8f   :  { %1864 = vmatpush.bf16.msrb.mxu0 %v3426_v56  ;;  %v4323_v8 = vld [vmem:[#allocation5 + $0x444] sm:$0xf]  ;;  %v3391_v9 = vld [vmem:[#allocation5 + $0x450] sm:$0xf0]  ;;  %v3794_v11 = vor.u32 %v4423_v3, %v3791_v4  ;;  %v4214_v1 = vld [vmem:[#allocation5 + $0xd4] sm:$0xf0] }
  0x90   :  { %1877 = vmatpush.bf16.msrb.mxu1 %v3554_v57  ;;  %1890 = vmatpush.bf16.msrb.mxu2 %v3682_v59  ;;  %v4355_v10 = vld [vmem:[#allocation5 + $0x544] sm:$0xf]  ;;  %v3519_v12 = vld [vmem:[#allocation5 + $0x550] sm:$0xf0]  ;;  %v3394_v17 = vor.u32 %v4323_v8, %v3391_v9  ;;  %v3349_v57 = vld [vmem:[#allocation5 + $0x3e8] sm:$0xf]  ;;  %v2950_v9 = vor.u32 %v4214_v1, %v2949_v0 }
  0x91   :  { %1903 = vmatpush.bf16.msrb.mxu3 %v3810_v63  ;;  %v4387_v13 = vld [vmem:[#allocation5 + $0x644] sm:$0xf]  ;;  %v3647_v14 = vld [vmem:[#allocation5 + $0x650] sm:$0xf0]  ;;  %v3522_v18 = vor.u32 %v4355_v10, %v3519_v12  ;;  %v4314_v59 = vld [vmem:[#allocation5 + $0x3f4] sm:$0xf0]  ;;  %v3222_v63 = vor.u32 %v4282_v53, %v3221_v52 }
  0x92   :  { %v4419_v15 = vld [vmem:[#allocation5 + $0x744] sm:$0xf]  ;;  %v3775_v16 = vld [vmem:[#allocation5 + $0x750] sm:$0xf0]  ;;  %v3650_v19 = vor.u32 %v4387_v13, %v3647_v14  ;;  %v3077_v2 = vld [vmem:[#allocation5 + $0x1c8] sm:$0xf]  ;;  %v3350_v3 = vor.u32 %v4314_v59, %v3349_v57 }
  0x93   :  { %1865 = vmatpush.bf16.msrb.mxu0 %v3410_v5  ;;  %v4319_v20 = vld [vmem:[#allocation5 + $0x424] sm:$0xf]  ;;  %v3375_v21 = vld [vmem:[#allocation5 + $0x430] sm:$0xf0]  ;;  %v3778_v23 = vor.u32 %v4419_v15, %v3775_v16  ;;  %v4246_v4 = vld [vmem:[#allocation5 + $0x1d4] sm:$0xf0] }
  0x94   :  { %1878 = vmatpush.bf16.msrb.mxu1 %v3538_v6  ;;  %1891 = vmatpush.bf16.msrb.mxu2 %v3666_v7  ;;  %v4351_v22 = vld [vmem:[#allocation5 + $0x524] sm:$0xf]  ;;  %v3503_v24 = vld [vmem:[#allocation5 + $0x530] sm:$0xf0]  ;;  %v3378_v29 = vor.u32 %v4319_v20, %v3375_v21  ;;  %v3205_v5 = vld [vmem:[#allocation5 + $0x2c8] sm:$0xf]  ;;  %v3078_v10 = vor.u32 %v4246_v4, %v3077_v2 }
  0x95   :  { %1904 = vmatpush.bf16.msrb.mxu3 %v3794_v11  ;;  %v4383_v25 = vld [vmem:[#allocation5 + $0x624] sm:$0xf]  ;;  %v3631_v26 = vld [vmem:[#allocation5 + $0x630] sm:$0xf0]  ;;  %v3506_v32 = vor.u32 %v4351_v22, %v3503_v24  ;;  %v4278_v6 = vld [vmem:[#allocation5 + $0x2d4] sm:$0xf0] }
  0x96   :  { %v4415_v27 = vld [vmem:[#allocation5 + $0x724] sm:$0xf]  ;;  %v3759_v28 = vld [vmem:[#allocation5 + $0x730] sm:$0xf0]  ;;  %v3634_v33 = vor.u32 %v4383_v25, %v3631_v26  ;;  %v3333_v7 = vld [vmem:[#allocation5 + $0x3c8] sm:$0xf]  ;;  %v3206_v11 = vor.u32 %v4278_v6, %v3205_v5 }
  0x97   :  { %1866 = vmatpush.bf16.msrb.mxu0 %v3394_v17  ;;  %v4315_v30 = vld [vmem:[#allocation5 + $0x404] sm:$0xf]  ;;  %v3359_v31 = vld [vmem:[#allocation5 + $0x410] sm:$0xf0]  ;;  %v3762_v39 = vor.u32 %v4415_v27, %v3759_v28  ;;  %v4310_v8 = vld [vmem:[#allocation5 + $0x3d4] sm:$0xf0] }
  0x98   :  { %1879 = vmatpush.bf16.msrb.mxu1 %v3522_v18  ;;  %1892 = vmatpush.bf16.msrb.mxu2 %v3650_v19  ;;  %v4347_v34 = vld [vmem:[#allocation5 + $0x504] sm:$0xf]  ;;  %v3487_v35 = vld [vmem:[#allocation5 + $0x510] sm:$0xf0]  ;;  %v3362_v48 = vor.u32 %v4315_v30, %v3359_v31  ;;  %v2933_v12 = vld [vmem:[#allocation5 + $0xa8] sm:$0xf]  ;;  %v3334_v15 = vor.u32 %v4310_v8, %v3333_v7 }
  0x99   :  { %v4379_v36 = vld [vmem:[#allocation5 + $0x604] sm:$0xf]  ;;  %1905 = vmatpush.bf16.msrb.mxu3 %v3778_v23  ;;  %v3615_v40 = vld [vmem:[#allocation5 + $0x610] sm:$0xf0]  ;;  %v3490_v55 = vor.u32 %v4347_v34, %v3487_v35  ;;  %v4210_v13 = vld [vmem:[#allocation5 + $0xb4] sm:$0xf0] }
  0x9a   :  { %v4411_v41 = vld [vmem:[#allocation5 + $0x704] sm:$0xf]  ;;  %v3743_v42 = vld [vmem:[#allocation5 + $0x710] sm:$0xf0]  ;;  %v3618_v56 = vor.u32 %v4379_v36, %v3615_v40  ;;  %v3061_v14 = vld [vmem:[#allocation5 + $0x1a8] sm:$0xf]  ;;  %v2934_v21 = vor.u32 %v4210_v13, %v2933_v12 }
  0x9b   :  { %1867 = vmatpush.bf16.msrb.mxu0 %v3378_v29  ;;  %v3746_v60 = vor.u32 %v4411_v41, %v3743_v42  ;;  %v4242_v16 = vld [vmem:[#allocation5 + $0x1b4] sm:$0xf0]  ;;  %v3189_v17 = vld [vmem:[#allocation5 + $0x2a8] sm:$0xf] }
  0x9c   :  { %1880 = vmatpush.bf16.msrb.mxu1 %v3506_v32  ;;  %1893 = vmatpush.bf16.msrb.mxu2 %v3634_v33  ;;  %v4274_v18 = vld [vmem:[#allocation5 + $0x2b4] sm:$0xf0]  ;;  %v3317_v19 = vld [vmem:[#allocation5 + $0x3a8] sm:$0xf]  ;;  %v3062_v22 = vor.u32 %v4242_v16, %v3061_v14 }
  0x9d   :  { %1906 = vmatpush.bf16.msrb.mxu3 %v3762_v39  ;;  %v4306_v20 = vld [vmem:[#allocation5 + $0x3b4] sm:$0xf0]  ;;  %v3190_v23 = vor.u32 %v4274_v18, %v3189_v17  ;;  %v2917_v24 = vld [vmem:[#allocation5 + $0x88] sm:$0xf] }
  0x9e   :  { %v4206_v25 = vld [vmem:[#allocation5 + $0x94] sm:$0xf0]  ;;  %v3045_v26 = vld [vmem:[#allocation5 + $0x188] sm:$0xf]  ;;  %v3318_v27 = vor.u32 %v4306_v20, %v3317_v19 }
  0x9f   :  { %1868 = vmatpush.bf16.msrb.mxu0 %v3362_v48  ;;  %v4238_v28 = vld [vmem:[#allocation5 + $0x194] sm:$0xf0]  ;;  %v3173_v29 = vld [vmem:[#allocation5 + $0x288] sm:$0xf]  ;;  %v2918_v33 = vor.u32 %v4206_v25, %v2917_v24 }
  0xa0   :  { %1881 = vmatpush.bf16.msrb.mxu1 %v3490_v55  ;;  %1894 = vmatpush.bf16.msrb.mxu2 %v3618_v56  ;;  %v4270_v30 = vld [vmem:[#allocation5 + $0x294] sm:$0xf0]  ;;  %v3301_v31 = vld [vmem:[#allocation5 + $0x388] sm:$0xf]  ;;  %v3046_v34 = vor.u32 %v4238_v28, %v3045_v26 }
  0xa1   :  { %1907 = vmatpush.bf16.msrb.mxu3 %v3746_v60  ;;  %v4302_v32 = vld [vmem:[#allocation5 + $0x394] sm:$0xf0]  ;;  %v3174_v35 = vor.u32 %v4270_v30, %v3173_v29  ;;  %v2901_v36 = vld [vmem:[#allocation5 + $0x68] sm:$0xf] }
  0xa2   :  { %1869 = vmatmul.bf16.vlgmr.msrb.gmra.mxu0 %v4749_v50  ;;  %v4202_v39 = vld [vmem:[#allocation5 + $0x74] sm:$0xf0]  ;;  %v3029_v40 = vld [vmem:[#allocation5 + $0x168] sm:$0xf]  ;;  %v3302_v41 = vor.u32 %v4302_v32, %v3301_v31 }
  0xa3   :  { %1913 = vmatpush.bf16.msra.mxu0 %v2966_v61  ;;  %1895 = vmatmul.bf16.vlgmr.msrb.gmra.mxu2 %v4747_v49  ;;  %v4234_v42 = vld [vmem:[#allocation5 + $0x174] sm:$0xf0]  ;;  %v3157_v43 = vld [vmem:[#allocation5 + $0x268] sm:$0xf]  ;;  %v2902_v51 = vor.u32 %v4202_v39, %v2901_v36 }
  0xa4   :  { %1926 = vmatpush.bf16.msra.mxu1 %v3094_v62  ;;  %1939 = vmatpush.bf16.msra.mxu2 %v3222_v63  ;;  %v4266_v44 = vld [vmem:[#allocation5 + $0x274] sm:$0xf0]  ;;  %v3285_v47 = vld [vmem:[#allocation5 + $0x368] sm:$0xf]  ;;  %v3030_v52 = vor.u32 %v4234_v42, %v3029_v40 }
  0xa5   :  { %1952 = vmatpush.bf16.msra.mxu3 %v3350_v3  ;;  %1882 = vmatmul.bf16.vlgmr.msrb.gmra.mxu1 %v4753_v58  ;;  %v4298_v48 = vld [vmem:[#allocation5 + $0x374] sm:$0xf0]  ;;  %v3158_v53 = vor.u32 %v4266_v44, %v3157_v43  ;;  %v2885_v55 = vld [vmem:[#allocation5 + $0x48] sm:$0xf] }
  0xa6   :  { %1908 = vmatmul.bf16.vlgmr.msrb.gmra.mxu3 %v4751_v54  ;;  %v4198_v56 = vld [vmem:[#allocation5 + $0x54] sm:$0xf0]  ;;  %v3013_v57 = vld [vmem:[#allocation5 + $0x148] sm:$0xf]  ;;  %v3286_v59 = vor.u32 %v4298_v48, %v3285_v47 }
  0xa7   :  { %1914 = vmatpush.bf16.msra.mxu0 %v2950_v9  ;;  %v4230_v60 = vld [vmem:[#allocation5 + $0x154] sm:$0xf0]  ;;  %v3141_v61 = vld [vmem:[#allocation5 + $0x248] sm:$0xf]  ;;  %v2886_v1 = vor.u32 %v4198_v56, %v2885_v55 }
  0xa8   :  { %1927 = vmatpush.bf16.msra.mxu1 %v3078_v10  ;;  %1940 = vmatpush.bf16.msra.mxu2 %v3206_v11  ;;  %v4262_v62 = vld [vmem:[#allocation5 + $0x254] sm:$0xf0]  ;;  %v3269_v63 = vld [vmem:[#allocation5 + $0x348] sm:$0xf]  ;;  %v3014_v2 = vor.u32 %v4230_v60, %v3013_v57 }
  0xa9   :  { %1953 = vmatpush.bf16.msra.mxu3 %v3334_v15  ;;  %v4294_v0 = vld [vmem:[#allocation5 + $0x354] sm:$0xf0]  ;;  %v3142_v3 = vor.u32 %v4262_v62, %v3141_v61  ;;  %v2869_v4 = vld [vmem:[#allocation5 + $0x28] sm:$0xf] }
  0xaa   :  { %v4194_v5 = vld [vmem:[#allocation5 + $0x34] sm:$0xf0]  ;;  %v2997_v6 = vld [vmem:[#allocation5 + $0x128] sm:$0xf]  ;;  %v3270_v7 = vor.u32 %v4294_v0, %v3269_v63 }
  0xab   :  { %1915 = vmatpush.bf16.msra.mxu0 %v2934_v21  ;;  %v4226_v8 = vld [vmem:[#allocation5 + $0x134] sm:$0xf0]  ;;  %v3125_v9 = vld [vmem:[#allocation5 + $0x228] sm:$0xf]  ;;  %v2870_v13 = vor.u32 %v4194_v5, %v2869_v4 }
  0xac   :  { %1928 = vmatpush.bf16.msra.mxu1 %v3062_v22  ;;  %1941 = vmatpush.bf16.msra.mxu2 %v3190_v23  ;;  %v4258_v10 = vld [vmem:[#allocation5 + $0x234] sm:$0xf0]  ;;  %v3253_v11 = vld [vmem:[#allocation5 + $0x328] sm:$0xf]  ;;  %v2998_v16 = vor.u32 %v4226_v8, %v2997_v6 }
  0xad   :  { %1954 = vmatpush.bf16.msra.mxu3 %v3318_v27  ;;  %v4290_v12 = vld [vmem:[#allocation5 + $0x334] sm:$0xf0]  ;;  %v2853_v14 = vld [vmem:[#allocation5 + $0x8] sm:$0xf]  ;;  %v3126_v17 = vor.u32 %v4258_v10, %v3125_v9 }
  0xae   :  { %v4190_v15 = vld [vmem:[#allocation5 + $0x14] sm:$0xf0]  ;;  %v2981_v18 = vld [vmem:[#allocation5 + $0x108] sm:$0xf]  ;;  %v3254_v21 = vor.u32 %v4290_v12, %v3253_v11 }
  0xaf   :  { %1916 = vmatpush.bf16.msra.mxu0 %v2918_v33  ;;  %v4222_v19 = vld [vmem:[#allocation5 + $0x114] sm:$0xf0]  ;;  %v3109_v20 = vld [vmem:[#allocation5 + $0x208] sm:$0xf]  ;;  %v2854_v28 = vor.u32 %v4190_v15, %v2853_v14 }
  0xb0   :  { %1929 = vmatpush.bf16.msra.mxu1 %v3046_v34  ;;  %1942 = vmatpush.bf16.msra.mxu2 %v3174_v35  ;;  %v4254_v22 = vld [vmem:[#allocation5 + $0x214] sm:$0xf0]  ;;  %v3237_v23 = vld [vmem:[#allocation5 + $0x308] sm:$0xf]  ;;  %v2982_v32 = vor.u32 %v4222_v19, %v2981_v18 }
  0xb1   :  { %1955 = vmatpush.bf16.msra.mxu3 %v3302_v41  ;;  %v4286_v24 = vld [vmem:[#allocation5 + $0x314] sm:$0xf0]  ;;  %v3477_v25 = vld [vmem:[#allocation5 + $0x4e8] sm:$0xf]  ;;  %v3110_v33 = vor.u32 %v4254_v22, %v3109_v20 }
  0xb2   :  { %v4346_v26 = vld [vmem:[#allocation5 + $0x4f4] sm:$0xf0]  ;;  %v3605_v27 = vld [vmem:[#allocation5 + $0x5e8] sm:$0xf]  ;;  %v3238_v36 = vor.u32 %v4286_v24, %v3237_v23 }
  0xb3   :  { %1917 = vmatpush.bf16.msra.mxu0 %v2902_v51  ;;  %v4378_v29 = vld [vmem:[#allocation5 + $0x5f4] sm:$0xf0]  ;;  %v3733_v30 = vld [vmem:[#allocation5 + $0x6e8] sm:$0xf]  ;;  %v3478_v39 = vor.u32 %v4346_v26, %v3477_v25 }
  0xb4   :  { %1930 = vmatpush.bf16.msra.mxu1 %v3030_v52  ;;  %1943 = vmatpush.bf16.msra.mxu2 %v3158_v53  ;;  %v4410_v31 = vld [vmem:[#allocation5 + $0x6f4] sm:$0xf0]  ;;  %v3861_v34 = vld [vmem:[#allocation5 + $0x7e8] sm:$0xf]  ;;  %v3606_v40 = vor.u32 %v4378_v29, %v3605_v27 }
  0xb5   :  { %1956 = vmatpush.bf16.msra.mxu3 %v3286_v59  ;;  %v4442_v35 = vld [vmem:[#allocation5 + $0x7f4] sm:$0xf0]  ;;  %v3734_v41 = vor.u32 %v4410_v31, %v3733_v30  ;;  %v3461_v42 = vld [vmem:[#allocation5 + $0x4c8] sm:$0xf] }
  0xb6   :  { %v4342_v43 = vld [vmem:[#allocation5 + $0x4d4] sm:$0xf0]  ;;  %v3589_v44 = vld [vmem:[#allocation5 + $0x5c8] sm:$0xf]  ;;  %v3862_v47 = vor.u32 %v4442_v35, %v3861_v34 }
  0xb7   :  { %1918 = vmatpush.bf16.msra.mxu0 %v2886_v1  ;;  %v4374_v48 = vld [vmem:[#allocation5 + $0x5d4] sm:$0xf0]  ;;  %v3717_v51 = vld [vmem:[#allocation5 + $0x6c8] sm:$0xf]  ;;  %v3462_v56 = vor.u32 %v4342_v43, %v3461_v42 }
  0xb8   :  { %1931 = vmatpush.bf16.msra.mxu1 %v3014_v2  ;;  %1944 = vmatpush.bf16.msra.mxu2 %v3142_v3  ;;  %v4406_v52 = vld [vmem:[#allocation5 + $0x6d4] sm:$0xf0]  ;;  %v3845_v53 = vld [vmem:[#allocation5 + $0x7c8] sm:$0xf]  ;;  %v3590_v57 = vor.u32 %v4374_v48, %v3589_v44 }
  0xb9   :  { %1957 = vmatpush.bf16.msra.mxu3 %v3270_v7  ;;  %v4438_v55 = vld [vmem:[#allocation5 + $0x7d4] sm:$0xf0]  ;;  %v3718_v59 = vor.u32 %v4406_v52, %v3717_v51  ;;  %v3445_v60 = vld [vmem:[#allocation5 + $0x4a8] sm:$0xf] }
  0xba   :  { %v4338_v61 = vld [vmem:[#allocation5 + $0x4b4] sm:$0xf0]  ;;  %v3573_v62 = vld [vmem:[#allocation5 + $0x5a8] sm:$0xf]  ;;  %v3846_v63 = vor.u32 %v4438_v55, %v3845_v53 }
  0xbb   :  { %1919 = vmatpush.bf16.msra.mxu0 %v2870_v13  ;;  %v4370_v0 = vld [vmem:[#allocation5 + $0x5b4] sm:$0xf0]  ;;  %v3701_v1 = vld [vmem:[#allocation5 + $0x6a8] sm:$0xf]  ;;  %v3446_v5 = vor.u32 %v4338_v61, %v3445_v60 }
  0xbc   :  { %1932 = vmatpush.bf16.msra.mxu1 %v2998_v16  ;;  %1945 = vmatpush.bf16.msra.mxu2 %v3126_v17  ;;  %v4402_v2 = vld [vmem:[#allocation5 + $0x6b4] sm:$0xf0]  ;;  %v3829_v3 = vld [vmem:[#allocation5 + $0x7a8] sm:$0xf]  ;;  %v3574_v6 = vor.u32 %v4370_v0, %v3573_v62 }
  0xbd   :  { %1958 = vmatpush.bf16.msra.mxu3 %v3254_v21  ;;  %v4434_v4 = vld [vmem:[#allocation5 + $0x7b4] sm:$0xf0]  ;;  %v3702_v7 = vor.u32 %v4402_v2, %v3701_v1  ;;  %v3429_v8 = vld [vmem:[#allocation5 + $0x488] sm:$0xf] }
  0xbe   :  { %v4334_v9 = vld [vmem:[#allocation5 + $0x494] sm:$0xf0]  ;;  %v3557_v10 = vld [vmem:[#allocation5 + $0x588] sm:$0xf]  ;;  %v3830_v11 = vor.u32 %v4434_v4, %v3829_v3 }
  0xbf   :  { %1920 = vmatpush.bf16.msra.mxu0 %v2854_v28  ;;  %v4366_v12 = vld [vmem:[#allocation5 + $0x594] sm:$0xf0]  ;;  %v3685_v13 = vld [vmem:[#allocation5 + $0x688] sm:$0xf]  ;;  %v3430_v17 = vor.u32 %v4334_v9, %v3429_v8 }
  0xc0   :  { %1933 = vmatpush.bf16.msra.mxu1 %v2982_v32  ;;  %1946 = vmatpush.bf16.msra.mxu2 %v3110_v33  ;;  %v4398_v14 = vld [vmem:[#allocation5 + $0x694] sm:$0xf0]  ;;  %v3813_v15 = vld [vmem:[#allocation5 + $0x788] sm:$0xf]  ;;  %v3558_v18 = vor.u32 %v4366_v12, %v3557_v10 }
  0xc1   :  { %1959 = vmatpush.bf16.msra.mxu3 %v3238_v36  ;;  %v4430_v16 = vld [vmem:[#allocation5 + $0x794] sm:$0xf0]  ;;  %v3686_v19 = vor.u32 %v4398_v14, %v3685_v13  ;;  %v3413_v20 = vld [vmem:[#allocation5 + $0x468] sm:$0xf]  ;;  %v4216_v13 = vld [vmem:[#allocation5 + $0xec] sm:$0xf] }
  0xc2   :  { %1921 = vmatmul.bf16.vlgmr.msra.gmra.mxu0 %v4737_v38  ;;  %v4330_v21 = vld [vmem:[#allocation5 + $0x474] sm:$0xf0]  ;;  %v3541_v22 = vld [vmem:[#allocation5 + $0x568] sm:$0xf]  ;;  %v3814_v23 = vor.u32 %v4430_v16, %v3813_v15  ;;  %v2967_v14 = vld [vmem:[#allocation5 + $0xf8] sm:$0xf0] }
  0xc3   :  { %1965 = vmatpush.bf16.msrb.mxu0 %v3478_v39  ;;  %1947 = vmatmul.bf16.vlgmr.msra.gmra.mxu2 %v4735_v37  ;;  %v4362_v24 = vld [vmem:[#allocation5 + $0x574] sm:$0xf0]  ;;  %v3669_v25 = vld [vmem:[#allocation5 + $0x668] sm:$0xf]  ;;  %v3414_v29 = vor.u32 %v4330_v21, %v3413_v20  ;;  %v4248_v15 = vld [vmem:[#allocation5 + $0x1ec] sm:$0xf] }
  0xc4   :  { %1978 = vmatpush.bf16.msrb.mxu1 %v3606_v40  ;;  %1991 = vmatpush.bf16.msrb.mxu2 %v3734_v41  ;;  %v4394_v26 = vld [vmem:[#allocation5 + $0x674] sm:$0xf0]  ;;  %v3797_v27 = vld [vmem:[#allocation5 + $0x768] sm:$0xf]  ;;  %v3542_v31 = vor.u32 %v4362_v24, %v3541_v22  ;;  %v4771_v41 = vld [vmem:[#allocation7] sm:$0xf] }
  0xc5   :  { %2004 = vmatpush.bf16.msrb.mxu3 %v3862_v47  ;;  %1934 = vmatmul.bf16.vlgmr.msra.gmra.mxu1 %v4741_v46  ;;  %v4426_v28 = vld [vmem:[#allocation5 + $0x774] sm:$0xf0]  ;;  %v3397_v30 = vld [vmem:[#allocation5 + $0x448] sm:$0xf]  ;;  %v3670_v32 = vor.u32 %v4394_v26, %v3669_v25  ;;  %v417_v55 = vperm.slane %v4771_v41, 0 }
  0xc6   :  { %1960 = vmatmul.bf16.vlgmr.msra.gmra.mxu3 %v4739_v45  ;;  %v4326_v33 = vld [vmem:[#allocation5 + $0x454] sm:$0xf0]  ;;  %v3525_v34 = vld [vmem:[#allocation5 + $0x548] sm:$0xf]  ;;  %v3798_v36 = vor.u32 %v4426_v28, %v3797_v27  ;;  %v3223_v20 = vld [vmem:[#allocation5 + $0x2f8] sm:$0xf0]  ;;  %v2970_v27 = vor.u32 %v4216_v13, %v2967_v14 }
  0xc7   :  { %1966 = vmatpush.bf16.msrb.mxu0 %v3462_v56  ;;  %v4358_v35 = vld [vmem:[#allocation5 + $0x554] sm:$0xf0]  ;;  %v3653_v39 = vld [vmem:[#allocation5 + $0x648] sm:$0xf]  ;;  %v3398_v44 = vor.u32 %v4326_v33, %v3397_v30  ;;  %v4312_v24 = vld [vmem:[#allocation5 + $0x3ec] sm:$0xf] }
  0xc8   :  { %1979 = vmatpush.bf16.msrb.mxu1 %v3590_v57  ;;  %1992 = vmatpush.bf16.msrb.mxu2 %v3718_v59  ;;  %v4390_v40 = vld [vmem:[#allocation5 + $0x654] sm:$0xf0]  ;;  %v3781_v42 = vld [vmem:[#allocation5 + $0x748] sm:$0xf]  ;;  %v3526_v48 = vor.u32 %v4358_v35, %v3525_v34  ;;  %v3351_v25 = vld [vmem:[#allocation5 + $0x3f8] sm:$0xf0] }
  0xc9   :  { %2005 = vmatpush.bf16.msrb.mxu3 %v3846_v63  ;;  %v4422_v43 = vld [vmem:[#allocation5 + $0x754] sm:$0xf0]  ;;  %v3381_v47 = vld [vmem:[#allocation5 + $0x428] sm:$0xf]  ;;  %v3654_v51 = vor.u32 %v4390_v40, %v3653_v39  ;;  %v4244_v33 = vld [vmem:[#allocation5 + $0x1cc] sm:$0xf] }
  0xca   :  { %v4322_v52 = vld [vmem:[#allocation5 + $0x434] sm:$0xf0]  ;;  %v3509_v53 = vld [vmem:[#allocation5 + $0x528] sm:$0xf]  ;;  %v3782_v56 = vor.u32 %v4422_v43, %v3781_v42  ;;  %v3079_v39 = vld [vmem:[#allocation5 + $0x1d8] sm:$0xf0] }
  0xcb   :  { %1967 = vmatpush.bf16.msrb.mxu0 %v3446_v5  ;;  %v4354_v57 = vld [vmem:[#allocation5 + $0x534] sm:$0xf0]  ;;  %v3637_v59 = vld [vmem:[#allocation5 + $0x628] sm:$0xf]  ;;  %v3382_v63 = vor.u32 %v4322_v52, %v3381_v47  ;;  %v4276_v40 = vld [vmem:[#allocation5 + $0x2cc] sm:$0xf]  ;;  %v3082_v52 = vor.u32 %v4244_v33, %v3079_v39 }
  0xcc   :  { %1980 = vmatpush.bf16.msrb.mxu1 %v3574_v6  ;;  %1993 = vmatpush.bf16.msrb.mxu2 %v3702_v7  ;;  %v4386_v60 = vld [vmem:[#allocation5 + $0x634] sm:$0xf0]  ;;  %v3765_v61 = vld [vmem:[#allocation5 + $0x728] sm:$0xf]  ;;  %v3510_v3 = vor.u32 %v4354_v57, %v3509_v53  ;;  %v3207_v42 = vld [vmem:[#allocation5 + $0x2d8] sm:$0xf0] }
  0xcd   :  { %2006 = vmatpush.bf16.msrb.mxu3 %v3830_v11  ;;  %v4418_v62 = vld [vmem:[#allocation5 + $0x734] sm:$0xf0]  ;;  %v3365_v0 = vld [vmem:[#allocation5 + $0x408] sm:$0xf]  ;;  %v3638_v4 = vor.u32 %v4386_v60, %v3637_v59  ;;  %v3335_v47 = vld [vmem:[#allocation5 + $0x3d8] sm:$0xf0]  ;;  %v3210_v53 = vor.u32 %v4276_v40, %v3207_v42 }
  0xce   :  { %v4318_v1 = vld [vmem:[#allocation5 + $0x414] sm:$0xf0]  ;;  %v3493_v5 = vld [vmem:[#allocation5 + $0x508] sm:$0xf]  ;;  %v3766_v9 = vor.u32 %v4418_v62, %v3765_v61  ;;  %v4240_v57 = vld [vmem:[#allocation5 + $0x1ac] sm:$0xf] }
  0xcf   :  { %1968 = vmatpush.bf16.msrb.mxu0 %v3430_v17  ;;  %v4350_v6 = vld [vmem:[#allocation5 + $0x514] sm:$0xf0]  ;;  %v3621_v7 = vld [vmem:[#allocation5 + $0x608] sm:$0xf]  ;;  %v3366_v17 = vor.u32 %v4318_v1, %v3365_v0  ;;  %v3063_v61 = vld [vmem:[#allocation5 + $0x1b8] sm:$0xf0] }
  0xd0   :  { %1981 = vmatpush.bf16.msrb.mxu1 %v3558_v18  ;;  %1994 = vmatpush.bf16.msrb.mxu2 %v3686_v19  ;;  %v4382_v10 = vld [vmem:[#allocation5 + $0x614] sm:$0xf0]  ;;  %v3749_v11 = vld [vmem:[#allocation5 + $0x708] sm:$0xf]  ;;  %v3095_v18 = vld [vmem:[#allocation5 + $0x1f8] sm:$0xf0]  ;;  %v3494_v22 = vor.u32 %v4350_v6, %v3493_v5 }
  0xd1   :  { %2007 = vmatpush.bf16.msrb.mxu3 %v3814_v23  ;;  %v4414_v12 = vld [vmem:[#allocation5 + $0x714] sm:$0xf0]  ;;  %v4280_v19 = vld [vmem:[#allocation5 + $0x2ec] sm:$0xf]  ;;  %v3622_v23 = vor.u32 %v4382_v10, %v3621_v7  ;;  %v3319_v1 = vld [vmem:[#allocation5 + $0x3b8] sm:$0xf0] }
  0xd2   :  { %v3750_v26 = vor.u32 %v4414_v12, %v3749_v11  ;;  %v3226_v30 = vor.u32 %v4280_v19, %v3223_v20  ;;  %v4272_v62 = vld [vmem:[#allocation5 + $0x2ac] sm:$0xf]  ;;  %v2919_v7 = vld [vmem:[#allocation5 + $0x98] sm:$0xf0] }
  0xd3   :  { %1969 = vmatpush.bf16.msrb.mxu0 %v3414_v29  ;;  %v1714_v2 = vpop.f32.mrf.mxu0  ;;  %v3098_v29 = vor.u32 %v4248_v15, %v3095_v18  ;;  %v4304_v0 = vld [vmem:[#allocation5 + $0x3ac] sm:$0xf]  ;;  %v3047_v11 = vld [vmem:[#allocation5 + $0x198] sm:$0xf0] }
  0xd4   :  { %1982 = vmatpush.bf16.msrb.mxu1 %v3542_v31  ;;  %1995 = vmatpush.bf16.msrb.mxu2 %v3670_v32  ;;  %v1715_v8 = vadd.f32 %v1714_v2, %v417_v55  ;;  %v1727_v16 = vpop.f32.mrf.mxu1  ;;  %v4212_v31 = vld [vmem:[#allocation5 + $0xcc] sm:$0xf]  ;;  %v2951_v32 = vld [vmem:[#allocation5 + $0xd8] sm:$0xf0]  ;;  %v3322_v10 = vor.u32 %v4304_v0, %v3319_v1 }
  0xd5   :  { %2008 = vmatpush.bf16.msrb.mxu3 %v3798_v36  ;;  %v3354_v36 = vor.u32 %v4312_v24, %v3351_v25  ;;  %v4208_v55 = vld [vmem:[#allocation5 + $0xac] sm:$0xf]  ;;  %v3175_v13 = vld [vmem:[#allocation5 + $0x298] sm:$0xf0] }
  0xd6   :  { %v1728_v21 = vadd.f32 %v1727_v16, %v1715_v8  ;;  %v4204_v6 = vld [vmem:[#allocation5 + $0x8c] sm:$0xf]  ;;  %v3303_v15 = vld [vmem:[#allocation5 + $0x398] sm:$0xf0] }
  0xd7   :  { %1970 = vmatpush.bf16.msrb.mxu0 %v3398_v44  ;;  %v4308_v44 = vld [vmem:[#allocation5 + $0x3cc] sm:$0xf]  ;;  %v2922_v16 = vor.u32 %v4204_v6, %v2919_v7  ;;  %v3031_v25 = vld [vmem:[#allocation5 + $0x178] sm:$0xf0] }
  0xd8   :  { %1983 = vmatpush.bf16.msrb.mxu1 %v3526_v48  ;;  %1996 = vmatpush.bf16.msrb.mxu2 %v3654_v51  ;;  %v1740_v28 = vpop.f32.mrf.mxu2  ;;  %v2954_v51 = vor.u32 %v4212_v31, %v2951_v32  ;;  %v3338_v60 = vor.u32 %v4308_v44, %v3335_v47  ;;  %v4236_v8 = vld [vmem:[#allocation5 + $0x18c] sm:$0xf]  ;;  %v3015_v42 = vld [vmem:[#allocation5 + $0x158] sm:$0xf0] }
  0xd9   :  { %2009 = vmatpush.bf16.msrb.mxu3 %v3782_v56  ;;  %v1741_v34 = vadd.f32 %v1740_v28, %v1728_v21  ;;  %v1753_v35 = vpop.f32.mrf.mxu3  ;;  %v2935_v56 = vld [vmem:[#allocation5 + $0xb8] sm:$0xf0]  ;;  %v4268_v12 = vld [vmem:[#allocation5 + $0x28c] sm:$0xf]  ;;  %v3050_v18 = vor.u32 %v4236_v8, %v3047_v11 }
  0xda   :  { %v2938_v2 = vor.u32 %v4208_v55, %v2935_v56  ;;  %v4300_v14 = vld [vmem:[#allocation5 + $0x38c] sm:$0xf]  ;;  %v3178_v19 = vor.u32 %v4268_v12, %v3175_v13  ;;  %v2903_v21 = vld [vmem:[#allocation5 + $0x78] sm:$0xf0] }
  0xdb   :  { %1971 = vmatpush.bf16.msrb.mxu0 %v3382_v63  ;;  %v1716_v43 = vpop.f32.mrf.mxu0  ;;  %v1754_v48 = vadd.f32 %v1753_v35, %v1741_v34  ;;  %v3191_v63 = vld [vmem:[#allocation5 + $0x2b8] sm:$0xf0]  ;;  %v4200_v20 = vld [vmem:[#allocation5 + $0x6c] sm:$0xf]  ;;  %v3306_v24 = vor.u32 %v4300_v14, %v3303_v15 }
  0xdc   :  { %1984 = vmatpush.bf16.msrb.mxu1 %v3510_v3  ;;  %1997 = vmatpush.bf16.msrb.mxu2 %v3638_v4  ;;  %v1729_v59 = vpop.f32.mrf.mxu1  ;;  %v3066_v4 = vor.u32 %v4240_v57, %v3063_v61  ;;  %v3194_v5 = vor.u32 %v4272_v62, %v3191_v63  ;;  %v4296_v28 = vld [vmem:[#allocation5 + $0x36c] sm:$0xf]  ;;  %v2906_v31 = vor.u32 %v4200_v20, %v2903_v21  ;;  %v3143_v44 = vld [vmem:[#allocation5 + $0x258] sm:$0xf0] }
  0xdd   :  { %2010 = vmatpush.bf16.msrb.mxu3 %v3766_v9  ;;  %v4196_v35 = vld [vmem:[#allocation5 + $0x4c] sm:$0xf]  ;;  %v2871_v62 = vld [vmem:[#allocation5 + $0x38] sm:$0xf0] }
  0xde   :  { %v4228_v39 = vld [vmem:[#allocation5 + $0x14c] sm:$0xf]  ;;  %v2999_v1 = vld [vmem:[#allocation5 + $0x138] sm:$0xf0] }
  0xdf   :  { %1972 = vmatpush.bf16.msrb.mxu0 %v3366_v17  ;;  %v4260_v43 = vld [vmem:[#allocation5 + $0x24c] sm:$0xf]  ;;  %v3018_v57 = vor.u32 %v4228_v39, %v3015_v42  ;;  %v2983_v13 = vld [vmem:[#allocation5 + $0x118] sm:$0xf0] }
  0xe0   :  { %1985 = vmatpush.bf16.msrb.mxu1 %v3494_v22  ;;  %1998 = vmatpush.bf16.msrb.mxu2 %v3622_v23  ;;  %v1742_v3 = vpop.f32.mrf.mxu2  ;;  %v4232_v22 = vld [vmem:[#allocation5 + $0x16c] sm:$0xf]  ;;  %v3146_v59 = vor.u32 %v4260_v43, %v3143_v44  ;;  %v3479_v21 = vld [vmem:[#allocation5 + $0x4f8] sm:$0xf0] }
  0xe1   :  { %2011 = vmatpush.bf16.msrb.mxu3 %v3750_v26  ;;  %v1755_v9 = vpop.f32.mrf.mxu3  ;;  %v4264_v26 = vld [vmem:[#allocation5 + $0x26c] sm:$0xf]  ;;  %v3034_v33 = vor.u32 %v4232_v22, %v3031_v25  ;;  %v3127_v3 = vld [vmem:[#allocation5 + $0x238] sm:$0xf0] }
  0xe2   :  { %1973 = vmatmul.bf16.vlgmr.msrb.gmra.mxu0 %v4749_v50  ;;  %v4192_v61 = vld [vmem:[#allocation5 + $0x2c] sm:$0xf]  ;;  %v2855_v9 = vld [vmem:[#allocation5 + $0x18] sm:$0xf0] }
  0xe3   :  { %2017 = vmatpush.bf16.msra.mxu0 %v2970_v27  ;;  %1999 = vmatmul.bf16.vlgmr.msrb.gmra.mxu2 %v4747_v49  ;;  %v1766_v17 = vpop.f32.mrf.mxu0  ;;  %v3159_v27 = vld [vmem:[#allocation5 + $0x278] sm:$0xf0]  ;;  %v4224_v63 = vld [vmem:[#allocation5 + $0x12c] sm:$0xf]  ;;  %v2874_v7 = vor.u32 %v4192_v61, %v2871_v62 }
  0xe4   :  { %2030 = vmatpush.bf16.msra.mxu1 %v3098_v29  ;;  %2043 = vmatpush.bf16.msra.mxu2 %v3226_v30  ;;  %v1767_v23 = vadd.f32 %v1766_v17, %v1754_v48  ;;  %v3287_v29 = vld [vmem:[#allocation5 + $0x378] sm:$0xf0]  ;;  %v1779_v30 = vpop.f32.mrf.mxu1  ;;  %v3162_v34 = vor.u32 %v4264_v26, %v3159_v27  ;;  %v4292_v48 = vld [vmem:[#allocation5 + $0x34c] sm:$0xf] }
  0xe5   :  { %2056 = vmatpush.bf16.msra.mxu3 %v3354_v36  ;;  %1986 = vmatmul.bf16.vlgmr.msrb.gmra.mxu1 %v4753_v58  ;;  %v2887_v36 = vld [vmem:[#allocation5 + $0x58] sm:$0xf0]  ;;  %v3290_v40 = vor.u32 %v4296_v28, %v3287_v29  ;;  %v4188_v8 = vld [vmem:[#allocation5 + $0xc] sm:$0xf] }
  0xe6   :  { %2012 = vmatmul.bf16.vlgmr.msrb.gmra.mxu3 %v4751_v54  ;;  %v1780_v32 = vadd.f32 %v1779_v30, %v1767_v23  ;;  %v2890_v55 = vor.u32 %v4196_v35, %v2887_v36  ;;  %v4220_v12 = vld [vmem:[#allocation5 + $0x10c] sm:$0xf]  ;;  %v3607_v25 = vld [vmem:[#allocation5 + $0x5f8] sm:$0xf0] }
  0xe7   :  { %2018 = vmatpush.bf16.msra.mxu0 %v2954_v51  ;;  %v3271_v51 = vld [vmem:[#allocation5 + $0x358] sm:$0xf0]  ;;  %v4252_v14 = vld [vmem:[#allocation5 + $0x20c] sm:$0xf]  ;;  %v2986_v28 = vor.u32 %v4220_v12, %v2983_v13 }
  0xe8   :  { %2031 = vmatpush.bf16.msra.mxu1 %v3082_v52  ;;  %2044 = vmatpush.bf16.msra.mxu2 %v3210_v53  ;;  %v1792_v47 = vpop.f32.mrf.mxu2  ;;  %v3274_v0 = vor.u32 %v4292_v48, %v3271_v51  ;;  %v4284_v17 = vld [vmem:[#allocation5 + $0x30c] sm:$0xf]  ;;  %v3735_v27 = vld [vmem:[#allocation5 + $0x6f8] sm:$0xf0] }
  0xe9   :  { %2057 = vmatpush.bf16.msra.mxu3 %v3338_v60  ;;  %v1793_v52 = vadd.f32 %v1792_v47, %v1780_v32  ;;  %v1805_v53 = vpop.f32.mrf.mxu3  ;;  %v4344_v20 = vld [vmem:[#allocation5 + $0x4ec] sm:$0xf]  ;;  %v3463_v39 = vld [vmem:[#allocation5 + $0x4d8] sm:$0xf0] }
  0xea   :  { %v4376_v22 = vld [vmem:[#allocation5 + $0x5ec] sm:$0xf]  ;;  %v3591_v43 = vld [vmem:[#allocation5 + $0x5d8] sm:$0xf0] }
  0xeb   :  { %2019 = vmatpush.bf16.msra.mxu0 %v2938_v2  ;;  %v1768_v56 = vpop.f32.mrf.mxu0  ;;  %v4778_v60 = vadd.f32 %v1805_v53, %v1793_v52  ;;  %v4256_v2 = vld [vmem:[#allocation5 + $0x22c] sm:$0xf]  ;;  %v3719_v47 = vld [vmem:[#allocation5 + $0x6d8] sm:$0xf0] }
  0xec   :  { %2032 = vmatpush.bf16.msra.mxu1 %v3066_v4  ;;  %2045 = vmatpush.bf16.msra.mxu2 %v3194_v5  ;;  %v4288_v4 = vld [vmem:[#allocation5 + $0x32c] sm:$0xf]  ;;  %v3255_v5 = vld [vmem:[#allocation5 + $0x338] sm:$0xf0]  ;;  %v1781_v6 = vpop.f32.mrf.mxu1  ;;  %v3130_v11 = vor.u32 %v4256_v2, %v3127_v3 }
  0xed   :  { %2058 = vmatpush.bf16.msra.mxu3 %v3322_v10  ;;  %v3002_v10 = vor.u32 %v4224_v63, %v2999_v1  ;;  %v3258_v15 = vor.u32 %v4288_v4, %v3255_v5  ;;  %v4408_v26 = vld [vmem:[#allocation5 + $0x6ec] sm:$0xf]  ;;  %v3847_v51 = vld [vmem:[#allocation5 + $0x7d8] sm:$0xf0] }
  0xee   :  { %v4440_v30 = vld [vmem:[#allocation5 + $0x7ec] sm:$0xf]  ;;  %v3738_v35 = vor.u32 %v4408_v26, %v3735_v27  ;;  %v3575_v62 = vld [vmem:[#allocation5 + $0x5b8] sm:$0xf0] }
  0xef   :  { %2020 = vmatpush.bf16.msra.mxu0 %v2922_v16  ;;  %v3111_v16 = vld [vmem:[#allocation5 + $0x218] sm:$0xf0]  ;;  %v4340_v36 = vld [vmem:[#allocation5 + $0x4cc] sm:$0xf] }
  0xf0   :  { %2033 = vmatpush.bf16.msra.mxu1 %v3050_v18  ;;  %2046 = vmatpush.bf16.msra.mxu2 %v3178_v19  ;;  %v3239_v18 = vld [vmem:[#allocation5 + $0x318] sm:$0xf0]  ;;  %v1794_v19 = vpop.f32.mrf.mxu2  ;;  %v3114_v29 = vor.u32 %v4252_v14, %v3111_v16  ;;  %v4404_v44 = vld [vmem:[#allocation5 + $0x6cc] sm:$0xf]  ;;  %v3466_v52 = vor.u32 %v4340_v36, %v3463_v39 }
  0xf1   :  { %2059 = vmatpush.bf16.msra.mxu3 %v3306_v24  ;;  %v1807_v23 = vpop.f32.mrf.mxu3  ;;  %v2858_v24 = vor.u32 %v4188_v8, %v2855_v9  ;;  %v3242_v32 = vor.u32 %v4284_v17, %v3239_v18  ;;  %v4436_v48 = vld [vmem:[#allocation5 + $0x7cc] sm:$0xf]  ;;  %v3831_v2 = vld [vmem:[#allocation5 + $0x7b8] sm:$0xf0] }
  0xf2   :  { %v4336_v56 = vld [vmem:[#allocation5 + $0x4ac] sm:$0xf]  ;;  %v3850_v61 = vor.u32 %v4436_v48, %v3847_v51  ;;  %v3559_v9 = vld [vmem:[#allocation5 + $0x598] sm:$0xf0] }
  0xf3   :  { %2021 = vmatpush.bf16.msra.mxu0 %v2906_v31  ;;  %v3863_v31 = vld [vmem:[#allocation5 + $0x7f8] sm:$0xf0]  ;;  %v4400_v63 = vld [vmem:[#allocation5 + $0x6ac] sm:$0xf] }
  0xf4   :  { %2034 = vmatpush.bf16.msra.mxu1 %v3034_v33  ;;  %2047 = vmatpush.bf16.msra.mxu2 %v3162_v34  ;;  %v3482_v33 = vor.u32 %v4344_v20, %v3479_v21  ;;  %v3610_v34 = vor.u32 %v4376_v22, %v3607_v25  ;;  %v3866_v42 = vor.u32 %v4440_v30, %v3863_v31  ;;  %v4432_v1 = vld [vmem:[#allocation5 + $0x7ac] sm:$0xf]  ;;  %v3415_v16 = vld [vmem:[#allocation5 + $0x478] sm:$0xf0] }
  0xf5   :  { %2060 = vmatpush.bf16.msra.mxu3 %v3290_v40  ;;  %v4372_v40 = vld [vmem:[#allocation5 + $0x5cc] sm:$0xf]  ;;  %v3834_v8 = vor.u32 %v4432_v1, %v3831_v2  ;;  %v3543_v20 = vld [vmem:[#allocation5 + $0x578] sm:$0xf0] }
  0xf6   :  { %v3594_v53 = vor.u32 %v4372_v40, %v3591_v43  ;;  %v4332_v6 = vld [vmem:[#allocation5 + $0x48c] sm:$0xf]  ;;  %v3671_v22 = vld [vmem:[#allocation5 + $0x678] sm:$0xf0] }
  0xf7   :  { %2022 = vmatpush.bf16.msra.mxu0 %v2890_v55  ;;  %v3722_v55 = vor.u32 %v4404_v44, %v3719_v47  ;;  %v4428_v12 = vld [vmem:[#allocation5 + $0x78c] sm:$0xf]  ;;  %v3783_v40 = vld [vmem:[#allocation5 + $0x758] sm:$0xf0] }
  0xf8   :  { %2035 = vmatpush.bf16.msra.mxu1 %v3018_v57  ;;  %2048 = vmatpush.bf16.msra.mxu2 %v3146_v59  ;;  %v3447_v57 = vld [vmem:[#allocation5 + $0x4b8] sm:$0xf0]  ;;  %v4368_v59 = vld [vmem:[#allocation5 + $0x5ac] sm:$0xf] }
  0xf9   :  { %2061 = vmatpush.bf16.msra.mxu3 %v3274_v0  ;;  %v3703_v0 = vld [vmem:[#allocation5 + $0x6b8] sm:$0xf0]  ;;  %v3450_v3 = vor.u32 %v4336_v56, %v3447_v57  ;;  %v3578_v4 = vor.u32 %v4368_v59, %v3575_v62  ;;  %v4360_v17 = vld [vmem:[#allocation5 + $0x56c] sm:$0xf] }
  0xfa   :  { %v3706_v5 = vor.u32 %v4400_v63, %v3703_v0  ;;  %v4392_v21 = vld [vmem:[#allocation5 + $0x66c] sm:$0xf]  ;;  %v3546_v26 = vor.u32 %v4360_v17, %v3543_v20  ;;  %v3383_v51 = vld [vmem:[#allocation5 + $0x438] sm:$0xf0]  ;;  %v418_v63 = vperm.slane %v4771_v41, 1 }
  0xfb   :  { %2023 = vmatpush.bf16.msra.mxu0 %v2874_v7  ;;  %v3431_v7 = vld [vmem:[#allocation5 + $0x498] sm:$0xf0]  ;;  %v4424_v23 = vld [vmem:[#allocation5 + $0x76c] sm:$0xf]  ;;  %v3674_v27 = vor.u32 %v4392_v21, %v3671_v22 }
  0xfc   :  { %2036 = vmatpush.bf16.msra.mxu1 %v3002_v10  ;;  %2049 = vmatpush.bf16.msra.mxu2 %v3130_v11  ;;  %v4396_v10 = vld [vmem:[#allocation5 + $0x68c] sm:$0xf]  ;;  %v3687_v11 = vld [vmem:[#allocation5 + $0x698] sm:$0xf0] }
  0xfd   :  { %2062 = vmatpush.bf16.msra.mxu3 %v3258_v15  ;;  %v3690_v14 = vor.u32 %v4396_v10, %v3687_v11  ;;  %v4328_v15 = vld [vmem:[#allocation5 + $0x46c] sm:$0xf]  ;;  %v3511_v56 = vld [vmem:[#allocation5 + $0x538] sm:$0xf0] }
  0xfe   :  { %v3418_v25 = vor.u32 %v4328_v15, %v3415_v16  ;;  %v4356_v30 = vld [vmem:[#allocation5 + $0x54c] sm:$0xf]  ;;  %v3639_v59 = vld [vmem:[#allocation5 + $0x638] sm:$0xf0] }
  0xff   :  { %2024 = vmatpush.bf16.msra.mxu0 %v2858_v24  ;;  %v4784_v13 = vpop.f32.mrf.mxu0  ;;  %v3799_v24 = vld [vmem:[#allocation5 + $0x778] sm:$0xf0]  ;;  %v4420_v39 = vld [vmem:[#allocation5 + $0x74c] sm:$0xf] }
 0x100   :  { %2037 = vmatpush.bf16.msra.mxu1 %v2986_v28  ;;  %2050 = vmatpush.bf16.msra.mxu2 %v3114_v29  ;;  %v4324_v28 = vld [vmem:[#allocation5 + $0x44c] sm:$0xf]  ;;  %v3399_v29 = vld [vmem:[#allocation5 + $0x458] sm:$0xf0]  ;;  %v1819_v41 = vadd.f32 %v4784_v13, %v418_v63  ;;  %v3981_v13 = vld [vmem:[#allocation8 + $0xe0] sm:$0xf] }
 0x101   :  { %2063 = vmatpush.bf16.msra.mxu3 %v3242_v32  ;;  %v3802_v32 = vor.u32 %v4424_v23, %v3799_v24  ;;  %v4320_v48 = vld [vmem:[#allocation5 + $0x42c] sm:$0xf]  ;;  %v3767_v62 = vld [vmem:[#allocation5 + $0x738] sm:$0xf0]  ;;  %v3917_v23 = vld [vmem:[#allocation8 + $0x60] sm:$0xf] }
 0x102   :  { %2025 = vmatmul.bf16.vlgmr.msra.gmra.mxu0 %v4737_v38  ;;  %v3815_v38 = vld [vmem:[#allocation5 + $0x798] sm:$0xf0]  ;;  %v4786_v18 = vpop.f32.mrf.mxu1  ;;  %v4384_v57 = vld [vmem:[#allocation5 + $0x62c] sm:$0xf]  ;;  %v3386_v0 = vor.u32 %v4320_v48, %v3383_v51  ;;  %v3893_v48 = vld [vmem:[#allocation8 + $0x30] sm:$0xf] }
 0x103   :  { %2069 = vmatpush.bf16.msrb.mxu0 %v3482_v33  ;;  %2051 = vmatmul.bf16.vlgmr.msra.gmra.mxu2 %v4735_v37  ;;  %v4364_v37 = vld [vmem:[#allocation5 + $0x58c] sm:$0xf]  ;;  %v3818_v19 = vor.u32 %v4428_v12, %v3815_v38  ;;  %v3527_v33 = vld [vmem:[#allocation5 + $0x558] sm:$0xf0]  ;;  %v3925_v38 = vld [vmem:[#allocation8 + $0x70] sm:$0xf]  ;;  %v1832_v22 = vadd.f32 %v4786_v18, %v1819_v41 }
 0x104   :  { %2082 = vmatpush.bf16.msrb.mxu1 %v3610_v34  ;;  %2095 = vmatpush.bf16.msrb.mxu2 %v3738_v35  ;;  %v4388_v34 = vld [vmem:[#allocation5 + $0x64c] sm:$0xf]  ;;  %v3655_v35 = vld [vmem:[#allocation5 + $0x658] sm:$0xf0]  ;;  %v3530_v44 = vor.u32 %v4356_v30, %v3527_v33  ;;  %v3973_v18 = vld [vmem:[#allocation8 + $0xd0] sm:$0xf] }
 0x105   :  { %2108 = vmatpush.bf16.msrb.mxu3 %v3866_v42  ;;  %2038 = vmatmul.bf16.vlgmr.msra.gmra.mxu1 %v4741_v46  ;;  %v3562_v46 = vor.u32 %v4364_v37, %v3559_v9  ;;  %v3402_v42 = vor.u32 %v4324_v28, %v3399_v29  ;;  %v3658_v47 = vor.u32 %v4388_v34, %v3655_v35  ;;  %v4316_v1 = vld [vmem:[#allocation5 + $0x40c] sm:$0xf]  ;;  %v3623_v9 = vld [vmem:[#allocation5 + $0x618] sm:$0xf0]  ;;  %v3909_v29 = vld [vmem:[#allocation8 + $0x50] sm:$0xf] }
 0x106   :  { %2064 = vmatmul.bf16.vlgmr.msra.gmra.mxu3 %v4739_v45  ;;  %v3434_v45 = vor.u32 %v4332_v6, %v3431_v7  ;;  %v4788_v31 = vpop.f32.mrf.mxu2  ;;  %v3495_v6 = vld [vmem:[#allocation5 + $0x518] sm:$0xf0]  ;;  %v4412_v10 = vld [vmem:[#allocation5 + $0x70c] sm:$0xf]  ;;  %v3885_v63 = vld [vmem:[#allocation8 + $0x20] sm:$0xf] }
 0x107   :  { %2070 = vmatpush.bf16.msrb.mxu0 %v3466_v52  ;;  %v1820_v43 = vpop.f32.mrf.mxu0  ;;  %v4352_v52 = vld [vmem:[#allocation5 + $0x52c] sm:$0xf]  ;;  %v3751_v12 = vld [vmem:[#allocation5 + $0x718] sm:$0xf0] }
 0x108   :  { %2083 = vmatpush.bf16.msrb.mxu1 %v3594_v53  ;;  %2096 = vmatpush.bf16.msrb.mxu2 %v3722_v55  ;;  %v3786_v55 = vor.u32 %v4420_v39, %v3783_v40  ;;  %v3514_v2 = vor.u32 %v4352_v52, %v3511_v56  ;;  %v4474_v15 = vld [vmem:[#allocation8 + $0xf4] sm:$0xf0]  ;;  %v4456_v24 = vld [vmem:[#allocation8 + $0x64] sm:$0xf0] }
 0x109   :  { %2109 = vmatpush.bf16.msrb.mxu3 %v3850_v61  ;;  %v4790_v36 = vpop.f32.mrf.mxu3  ;;  %v4416_v61 = vld [vmem:[#allocation5 + $0x72c] sm:$0xf]  ;;  %v4454_v30 = vld [vmem:[#allocation8 + $0x54] sm:$0xf0] }
 0x10a   :  { %v1833_v53 = vpop.f32.mrf.mxu1  ;;  %v3770_v37 = vor.u32 %v4416_v61, %v3767_v62  ;;  %v3910_v33 = vor.u32 %v4454_v30, %v3909_v29  ;;  %v4452_v39 = vld [vmem:[#allocation8 + $0x44] sm:$0xf0]  ;;  %v4473_v29 = vld [vmem:[#allocation8 + $0xf4] sm:$0xf]  ;;  %v3991_v30 = vld [vmem:[#allocation8 + $0xf8] sm:$0xf0] }
 0x10b   :  { %2071 = vmatpush.bf16.msrb.mxu0 %v3450_v3  ;;  %v3642_v3 = vor.u32 %v4384_v57, %v3639_v59  ;;  %v4468_v40 = vld [vmem:[#allocation8 + $0xc4] sm:$0xf0]  ;;  %v3957_v53 = vld [vmem:[#allocation8 + $0xb0] sm:$0xf]  ;;  %v4045_v57 = vld [vmem:[#allocation8 + $0x160] sm:$0xf] }
 0x10c   :  { %2084 = vmatpush.bf16.msrb.mxu1 %v3578_v4  ;;  %2097 = vmatpush.bf16.msrb.mxu2 %v3706_v5  ;;  %v3367_v4 = vld [vmem:[#allocation5 + $0x418] sm:$0xf0]  ;;  %v4348_v5 = vld [vmem:[#allocation5 + $0x50c] sm:$0xf] }
 0x10d   :  { %2110 = vmatpush.bf16.msrb.mxu3 %v3834_v8  ;;  %v4380_v8 = vld [vmem:[#allocation5 + $0x60c] sm:$0xf]  ;;  %v3498_v16 = vor.u32 %v4348_v5, %v3495_v6 }
 0x10e   :  { %v1846_v7 = vpop.f32.mrf.mxu2  ;;  %v3626_v17 = vor.u32 %v4380_v8, %v3623_v9  ;;  %v4488_v59 = vld [vmem:[#allocation8 + $0x164] sm:$0xf0]  ;;  %v4037_v8 = vld [vmem:[#allocation8 + $0x150] sm:$0xf]  ;;  %v4486_v9 = vld [vmem:[#allocation8 + $0x154] sm:$0xf0] }
 0x10f   :  { %2072 = vmatpush.bf16.msrb.mxu0 %v3434_v45  ;;  %v4458_v45 = vld [vmem:[#allocation8 + $0x74] sm:$0xf0] }
 0x110   :  { %2085 = vmatpush.bf16.msrb.mxu1 %v3562_v46  ;;  %2098 = vmatpush.bf16.msrb.mxu2 %v3690_v14  ;;  %v3370_v46 = vor.u32 %v4316_v1, %v3367_v4  ;;  %v3989_v14 = vld [vmem:[#allocation8 + $0xf0] sm:$0xf]  ;;  %v3926_v20 = vor.u32 %v4458_v45, %v3925_v38  ;;  %v4046_v1 = vor.u32 %v4488_v59, %v4045_v57  ;;  %v4464_v4 = vld [vmem:[#allocation8 + $0xa4] sm:$0xf0]  ;;  %v4469_v57 = vld [vmem:[#allocation8 + $0xd4] sm:$0xf] }
 0x111   :  { %2111 = vmatpush.bf16.msrb.mxu3 %v3818_v19  ;;  %v1859_v11 = vpop.f32.mrf.mxu3  ;;  %v3754_v19 = vor.u32 %v4412_v10, %v3751_v12  ;;  %v3990_v21 = vor.u32 %v4474_v15, %v3989_v14  ;;  %v4446_v12 = vld [vmem:[#allocation8 + $0x14] sm:$0xf0]  ;;  %v4038_v38 = vor.u32 %v4486_v9, %v4037_v8  ;;  %v3941_v45 = vld [vmem:[#allocation8 + $0x90] sm:$0xf]  ;;  %v2121_v14 = vmul.f32 0.2, %v4778_v60 }
 0x112   :  { %v3877_v11 = vld [vmem:[#allocation8 + $0x10] sm:$0xf]  ;;  %v3975_v59 = vld [vmem:[#allocation8 + $0xd8] sm:$0xf0] }
 0x113   :  { %2073 = vmatpush.bf16.msrb.mxu0 %v3418_v25  ;;  %v4472_v25 = vld [vmem:[#allocation8 + $0xe4] sm:$0xf0]  ;;  %v4055_v8 = vld [vmem:[#allocation8 + $0x178] sm:$0xf0] }
 0x114   :  { %2086 = vmatpush.bf16.msrb.mxu1 %v3546_v26  ;;  %2099 = vmatpush.bf16.msrb.mxu2 %v3674_v27  ;;  %v3918_v26 = vor.u32 %v4456_v24, %v3917_v23  ;;  %v1845_v27 = vadd.f32 %v4788_v31, %v1832_v22  ;;  %v3982_v28 = vor.u32 %v4472_v25, %v3981_v13  ;;  %v3965_v31 = vld [vmem:[#allocation8 + $0xc0] sm:$0xf]  ;;  %v4444_v22 = vld [vmem:[#allocation8 + $0x4] sm:$0xf0] }
 0x115   :  { %2112 = vmatpush.bf16.msrb.mxu3 %v3802_v32  ;;  %v4470_v32 = vld [vmem:[#allocation8 + $0xd4] sm:$0xf0]  ;;  %v3933_v23 = vld [vmem:[#allocation8 + $0x80] sm:$0xf]  ;;  %v4460_v25 = vld [vmem:[#allocation8 + $0x84] sm:$0xf0] }
 0x116   :  { %v1858_v34 = vadd.f32 %v4790_v36, %v1845_v27  ;;  %v3974_v35 = vor.u32 %v4470_v32, %v3973_v18  ;;  %v3927_v27 = vld [vmem:[#allocation8 + $0x78] sm:$0xf0] }
 0x117   :  { %2074 = vmatpush.bf16.msrb.mxu0 %v3402_v42 }
 0x118   :  { %2087 = vmatpush.bf16.msrb.mxu1 %v3530_v44  ;;  %2100 = vmatpush.bf16.msrb.mxu2 %v3658_v47  ;;  %v4490_v44 = vld [vmem:[#allocation8 + $0x174] sm:$0xf0] }
 0x119   :  { %2113 = vmatpush.bf16.msrb.mxu3 %v3786_v55  ;;  %v4466_v55 = vld [vmem:[#allocation8 + $0xb4] sm:$0xf0] }
 0x11a   :  { %v3958_v61 = vor.u32 %v4466_v55, %v3957_v53  ;;  %v4478_v53 = vld [vmem:[#allocation8 + $0x114] sm:$0xf0] }
 0x11b   :  { %2075 = vmatpush.bf16.msrb.mxu0 %v3386_v0  ;;  %v4448_v0 = vld [vmem:[#allocation8 + $0x24] sm:$0xf0] }
 0x11c   :  { %2088 = vmatpush.bf16.msrb.mxu1 %v3514_v2  ;;  %2101 = vmatpush.bf16.msrb.mxu2 %v3642_v3  ;;  %v3949_v3 = vld [vmem:[#allocation8 + $0xa0] sm:$0xf]  ;;  %v3886_v6 = vor.u32 %v4448_v0, %v3885_v63  ;;  %v4476_v63 = vld [vmem:[#allocation8 + $0x104] sm:$0xf0] }
 0x11d   :  { %2114 = vmatpush.bf16.msrb.mxu3 %v3770_v37  ;;  %v3950_v10 = vor.u32 %v4464_v4, %v3949_v3  ;;  %v3903_v3 = vld [vmem:[#allocation8 + $0x48] sm:$0xf0]  ;;  %v4467_v4 = vld [vmem:[#allocation8 + $0xc4] sm:$0xf] }
 0x11f   :  { %2076 = vmatpush.bf16.msrb.mxu0 %v3370_v46  ;;  %v1870_v43 = vpop.f32.mrf.mxu0  ;;  %v4462_v46 = vld [vmem:[#allocation8 + $0x94] sm:$0xf0] }
 0x120   :  { %2089 = vmatpush.bf16.msrb.mxu1 %v3498_v16  ;;  %2102 = vmatpush.bf16.msrb.mxu2 %v3626_v17  ;;  %v1871_v47 = vadd.f32 %v1870_v43, %v1858_v34  ;;  %v3878_v16 = vor.u32 %v4446_v12, %v3877_v11  ;;  %v4029_v17 = vld [vmem:[#allocation8 + $0x140] sm:$0xf]  ;;  %v4482_v34 = vld [vmem:[#allocation8 + $0x134] sm:$0xf0]  ;;  %v3919_v43 = vld [vmem:[#allocation8 + $0x68] sm:$0xf0] }
 0x121   :  { %2115 = vmatpush.bf16.msrb.mxu3 %v3754_v19  ;;  %v4484_v19 = vld [vmem:[#allocation8 + $0x144] sm:$0xf0]  ;;  %v3895_v11 = vld [vmem:[#allocation8 + $0x38] sm:$0xf0] }
 0x122   :  { %2077 = vmatmul.bf16.vlgmr.msrb.gmra.mxu0 %v4749_v50  ;;  %v3901_v50 = vld [vmem:[#allocation8 + $0x40] sm:$0xf]  ;;  %v1883_v51 = vpop.f32.mrf.mxu1  ;;  %v4030_v13 = vor.u32 %v4484_v19, %v4029_v17  ;;  %v4447_v19 = vld [vmem:[#allocation8 + $0x24] sm:$0xf] }
 0x123   :  { %2523 = vmatpush.bf16.msra.mxu0 %v3926_v20  ;;  %2090 = vmatmul.bf16.vlgmr.msrb.gmra.mxu1 %v4753_v58  ;;  %v3902_v42 = vor.u32 %v4452_v39, %v3901_v50  ;;  %v4053_v58 = vld [vmem:[#allocation8 + $0x170] sm:$0xf]  ;;  %v1884_v36 = vadd.f32 %v1883_v51, %v1871_v47  ;;  %v3942_v20 = vor.u32 %v4462_v46, %v3941_v45  ;;  %v4013_v47 = vld [vmem:[#allocation8 + $0x120] sm:$0xf]  ;;  %v3959_v45 = vld [vmem:[#allocation8 + $0xb8] sm:$0xf0] }
 0x124   :  { %2536 = vmatpush.bf16.msra.mxu1 %v3990_v21  ;;  %2103 = vmatmul.bf16.vlgmr.msrb.gmra.mxu2 %v4747_v49  ;;  %v3966_v49 = vor.u32 %v4468_v40, %v3965_v31  ;;  %v4054_v52 = vor.u32 %v4490_v44, %v4053_v58  ;;  %v3869_v21 = vld [vmem:[#allocation8] sm:$0xf]  ;;  %v3934_v50 = vor.u32 %v4460_v25, %v3933_v23  ;;  %v4471_v58 = vld [vmem:[#allocation8 + $0xe4] sm:$0xf]  ;;  %v3983_v44 = vld [vmem:[#allocation8 + $0xe8] sm:$0xf0] }
 0x125   :  { %2116 = vmatmul.bf16.vlgmr.msrb.gmra.mxu3 %v4751_v54  ;;  %v4450_v54 = vld [vmem:[#allocation8 + $0x34] sm:$0xf0]  ;;  %v3870_v32 = vor.u32 %v4444_v22, %v3869_v21  ;;  %v3994_v40 = vor.u32 %v4473_v29, %v3991_v30  ;;  %v3986_v55 = vor.u32 %v4471_v58, %v3983_v44  ;;  %v4463_v22 = vld [vmem:[#allocation8 + $0xa4] sm:$0xf]  ;;  %v3951_v23 = vld [vmem:[#allocation8 + $0xa8] sm:$0xf0] }
 0x126   :  { %2549 = vmatpush.bf16.msra.mxu2 %v4054_v52  ;;  %v3894_v56 = vor.u32 %v4450_v54, %v3893_v48  ;;  %v1896_v62 = vpop.f32.mrf.mxu2  ;;  %v4480_v48 = vld [vmem:[#allocation8 + $0x124] sm:$0xf0]  ;;  %v4005_v52 = vld [vmem:[#allocation8 + $0x110] sm:$0xf]  ;;  %v4445_v29 = vld [vmem:[#allocation8 + $0x14] sm:$0xf] }
 0x127   :  { %2524 = vmatpush.bf16.msra.mxu0 %v3918_v26  ;;  %v1897_v2 = vadd.f32 %v1896_v62, %v1884_v36  ;;  %v1872_v37 = vpop.f32.mrf.mxu0  ;;  %v4457_v26 = vld [vmem:[#allocation8 + $0x74] sm:$0xf]  ;;  %v4014_v51 = vor.u32 %v4480_v48, %v4013_v47  ;;  %v3997_v62 = vld [vmem:[#allocation8 + $0x100] sm:$0xf]  ;;  %v3879_v30 = vld [vmem:[#allocation8 + $0x18] sm:$0xf0] }
 0x128   :  { %2537 = vmatpush.bf16.msra.mxu1 %v3982_v28  ;;  %v3930_v39 = vor.u32 %v4457_v26, %v3927_v27  ;;  %v4453_v36 = vld [vmem:[#allocation8 + $0x54] sm:$0xf]  ;;  %v4039_v27 = vld [vmem:[#allocation8 + $0x158] sm:$0xf0]  ;;  %v4443_v58 = vld [vmem:[#allocation8 + $0x4] sm:$0xf] }
 0x129   :  { %v1909_v5 = vpop.f32.mrf.mxu3  ;;  %v4489_v37 = vld [vmem:[#allocation8 + $0x174] sm:$0xf]  ;;  %v3871_v44 = vld [vmem:[#allocation8 + $0x8] sm:$0xf0]  ;;  %v4459_v48 = vld [vmem:[#allocation8 + $0x84] sm:$0xf] }
 0x12a   :  { %2550 = vmatpush.bf16.msra.mxu2 %v4046_v1  ;;  %v1910_v7 = vadd.f32 %v1909_v5, %v1897_v2  ;;  %v1885_v41 = vpop.f32.mrf.mxu1  ;;  %v3978_v1 = vor.u32 %v4469_v57, %v3975_v59  ;;  %v4451_v2 = vld [vmem:[#allocation8 + $0x44] sm:$0xf]  ;;  %v3967_v5 = vld [vmem:[#allocation8 + $0xc8] sm:$0xf0]  ;;  %v4485_v26 = vld [vmem:[#allocation8 + $0x154] sm:$0xf] }
 0x12b   :  { %2525 = vmatpush.bf16.msra.mxu0 %v3910_v33  ;;  %v4021_v33 = vld [vmem:[#allocation8 + $0x130] sm:$0xf]  ;;  %v3970_v9 = vor.u32 %v4467_v4, %v3967_v5  ;;  %v4058_v41 = vor.u32 %v4489_v37, %v4055_v8  ;;  %v4479_v59 = vld [vmem:[#allocation8 + $0x124] sm:$0xf]  ;;  %v4477_v4 = vld [vmem:[#allocation8 + $0x114] sm:$0xf] }
 0x12c   :  { %2538 = vmatpush.bf16.msra.mxu1 %v3974_v35  ;;  %v2122_v15 = vmul.f32 0.2, %v1910_v7  ;;  %v2125_v35 = vmax.f32 %v4778_v60, %v2121_v14  ;;  %v4022_v31 = vor.u32 %v4482_v34, %v4021_v33  ;;  %v4461_v33 = vld [vmem:[#allocation8 + $0x94] sm:$0xf]  ;;  %v3943_v34 = vld [vmem:[#allocation8 + $0x98] sm:$0xf0] }
 0x12d   :  { %v4007_v5 = vld [vmem:[#allocation8 + $0x118] sm:$0xf0]  ;;  %v4475_v37 = vld [vmem:[#allocation8 + $0x104] sm:$0xf]  ;;  %v3999_v8 = vld [vmem:[#allocation8 + $0x108] sm:$0xf0] }
 0x12e   :  { %2551 = vmatpush.bf16.msra.mxu2 %v4038_v38  ;;  %v1898_v24 = vpop.f32.mrf.mxu2  ;;  %v2126_v18 = vmax.f32 %v1910_v7, %v2122_v15  ;;  %v4805_v54 = vpack.c.bf16 %v2125_v35, %v2125_v35  ;;  %v3906_v7 = vor.u32 %v4451_v2, %v3903_v3  ;;  %v4465_v38 = vld [vmem:[#allocation8 + $0xb4] sm:$0xf]  ;;  %v4487_v15 = vld [vmem:[#allocation8 + $0x164] sm:$0xf] }
 0x12f   :  { %2526 = vmatpush.bf16.msra.mxu0 %v3902_v42  ;;  %v4455_v42 = vld [vmem:[#allocation8 + $0x64] sm:$0xf]  ;;  %v3962_v17 = vor.u32 %v4465_v38, %v3959_v45 }
 0x130   :  { %2539 = vmatpush.bf16.msra.mxu1 %v3966_v49  ;;  %v4803_v49 = vpack.c.bf16 %v2126_v18, %v2126_v18  ;;  %v3922_v60 = vor.u32 %v4455_v42, %v3919_v43  ;;  %v4031_v42 = vld [vmem:[#allocation8 + $0x148] sm:$0xf0]  ;;  %v3946_v43 = vor.u32 %v4461_v33, %v3943_v34 }
 0x131   :  { %v1911_v28 = vpop.f32.mrf.mxu3 }
 0x132   :  { %2552 = vmatpush.bf16.msra.mxu2 %v4030_v13  ;;  %v3954_v28 = vor.u32 %v4463_v22, %v3951_v23 }
 0x133   :  { %2527 = vmatpush.bf16.msra.mxu0 %v3894_v56  ;;  %v3911_v56 = vld [vmem:[#allocation8 + $0x58] sm:$0xf0] }
 0x134   :  { %2540 = vmatpush.bf16.msra.mxu1 %v3958_v61  ;;  %v4006_v61 = vor.u32 %v4478_v53, %v4005_v52  ;;  %v3914_v0 = vor.u32 %v4453_v36, %v3911_v56  ;;  %v4481_v53 = vld [vmem:[#allocation8 + $0x134] sm:$0xf]  ;;  %v3874_v56 = vor.u32 %v4443_v58, %v3871_v44 }
 0x135   :  { %v4505_v44 = vld [vmem:[#allocation8 + $0x1f4] sm:$0xf] }
 0x136   :  { %2553 = vmatpush.bf16.msra.mxu2 %v4022_v31 }
 0x137   :  { %2528 = vmatpush.bf16.msra.mxu0 %v3886_v6  ;;  %v3998_v6 = vor.u32 %v4476_v63, %v3997_v62  ;;  %v4117_v63 = vld [vmem:[#allocation8 + $0x1f0] sm:$0xf] }
 0x138   :  { %2541 = vmatpush.bf16.msra.mxu1 %v3950_v10  ;;  %v4449_v10 = vld [vmem:[#allocation8 + $0x34] sm:$0xf] }
 0x139   :  { %v3898_v14 = vor.u32 %v4449_v10, %v3895_v11 }
 0x13a   :  { %2554 = vmatpush.bf16.msra.mxu2 %v4014_v51 }
 0x13b   :  { %2529 = vmatpush.bf16.msra.mxu0 %v3878_v16  ;;  %v4047_v16 = vld [vmem:[#allocation8 + $0x168] sm:$0xf0] }
 0x13c   :  { %2542 = vmatpush.bf16.msra.mxu1 %v3942_v20  ;;  %v3887_v20 = vld [vmem:[#allocation8 + $0x28] sm:$0xf0]  ;;  %v4050_v21 = vor.u32 %v4487_v15, %v4047_v16  ;;  %v4502_v15 = vld [vmem:[#allocation8 + $0x1d4] sm:$0xf0] }
 0x13d   :  { %v3890_v25 = vor.u32 %v4447_v19, %v3887_v20  ;;  %v4093_v20 = vld [vmem:[#allocation8 + $0x1c0] sm:$0xf] }
 0x13e   :  { %2555 = vmatpush.bf16.msra.mxu2 %v4006_v61  ;;  %v4015_v61 = vld [vmem:[#allocation8 + $0x128] sm:$0xf0] }
 0x13f   :  { %2530 = vmatpush.bf16.msra.mxu0 %v3870_v32  ;;  %v1922_v12 = vpop.f32.mrf.mxu0  ;;  %v4042_v32 = vor.u32 %v4485_v26, %v4039_v27 }
 0x140   :  { %2543 = vmatpush.bf16.msra.mxu1 %v3934_v50  ;;  %v3882_v50 = vor.u32 %v4445_v29, %v3879_v30  ;;  %v4077_v30 = vld [vmem:[#allocation8 + $0x1a0] sm:$0xf] }
 0x142   :  { %2531 = vmatmul.bf16.vlgmr.msra.gmra.mxu0 %v4805_v54  ;;  %v1935_v46 = vpop.f32.mrf.mxu1  ;;  %2556 = vmatpush.bf16.msra.mxu2 %v3998_v6  ;;  %v4010_v6 = vor.u32 %v4477_v4, %v4007_v5  ;;  %v4497_v5 = vld [vmem:[#allocation8 + $0x1b4] sm:$0xf] }
 0x143   :  { %2575 = vmatpush.bf16.msrb.mxu0 %v3930_v39  ;;  %2544 = vmatmul.bf16.vlgmr.msra.gmra.mxu1 %v4803_v49  ;;  %v4809_v39 = vld [vmem:[#allocation7] sm:$0xf] }
 0x144   :  { %2588 = vmatpush.bf16.msrb.mxu1 %v3994_v40  ;;  %v419_v31 = vperm.slane %v4809_v39, 2  ;;  %v4483_v40 = vld [vmem:[#allocation8 + $0x144] sm:$0xf] }
 0x145   :  { %v4034_v47 = vor.u32 %v4483_v40, %v4031_v42  ;;  %v4061_v42 = vld [vmem:[#allocation8 + $0x180] sm:$0xf] }
 0x146   :  { %2601 = vmatpush.bf16.msrb.mxu2 %v4058_v41  ;;  %v1948_v24 = vpop.f32.mrf.mxu2  ;;  %v1923_v36 = vadd.f32 %v1922_v12, %v419_v31  ;;  %v4109_v12 = vld [vmem:[#allocation8 + $0x1e0] sm:$0xf]  ;;  %v4504_v41 = vld [vmem:[#allocation8 + $0x1e4] sm:$0xf0]  ;;  %v4494_v31 = vld [vmem:[#allocation8 + $0x194] sm:$0xf0] }
 0x147   :  { %2576 = vmatpush.bf16.msrb.mxu0 %v3922_v60  ;;  %v1924_v18 = vpop.f32.mrf.mxu0  ;;  %v3935_v60 = vld [vmem:[#allocation8 + $0x88] sm:$0xf0] }
 0x148   :  { %2589 = vmatpush.bf16.msrb.mxu1 %v3986_v55  ;;  %v4023_v55 = vld [vmem:[#allocation8 + $0x138] sm:$0xf0]  ;;  %v3938_v62 = vor.u32 %v4459_v48, %v3935_v60  ;;  %v1936_v3 = vadd.f32 %v1935_v46, %v1923_v36  ;;  %v4110_v46 = vor.u32 %v4504_v41, %v4109_v12  ;;  %v4496_v18 = vld [vmem:[#allocation8 + $0x1a4] sm:$0xf0]  ;;  %v4493_v12 = vld [vmem:[#allocation8 + $0x194] sm:$0xf] }
 0x149   :  { %v1961_v13 = vpop.f32.mrf.mxu3  ;;  %v4026_v57 = vor.u32 %v4481_v53, %v4023_v55  ;;  %v4111_v53 = vld [vmem:[#allocation8 + $0x1e8] sm:$0xf0]  ;;  %v4071_v41 = vld [vmem:[#allocation8 + $0x198] sm:$0xf0] }
 0x14a   :  { %2602 = vmatpush.bf16.msrb.mxu2 %v4050_v21  ;;  %v1937_v35 = vpop.f32.mrf.mxu1  ;;  %v4500_v21 = vld [vmem:[#allocation8 + $0x1c4] sm:$0xf0] }
 0x14b   :  { %2577 = vmatpush.bf16.msrb.mxu0 %v3914_v0  ;;  %v4506_v0 = vld [vmem:[#allocation8 + $0x1f4] sm:$0xf0]  ;;  %v4094_v22 = vor.u32 %v4500_v21, %v4093_v20  ;;  %v4078_v35 = vor.u32 %v4496_v18, %v4077_v30  ;;  %v2197_v30 = vld [vmem:[%s4825_s4] sm:$0x3] }
 0x14c   :  { %2590 = vmatpush.bf16.msrb.mxu1 %v3978_v1  ;;  %v4018_v1 = vor.u32 %v4479_v59, %v4015_v61  ;;  %v4118_v2 = vor.u32 %v4506_v0, %v4117_v63  ;;  %v4499_v0 = vld [vmem:[#allocation8 + $0x1c4] sm:$0xf]  ;;  %v2199_v18 = vperm.slane %v2197_v30, 0 }
 0x14e   :  { %2603 = vmatpush.bf16.msrb.mxu2 %v4042_v32  ;;  %v1950_v51 = vpop.f32.mrf.mxu2  ;;  %2562 = vmatpush.bf16.msra.mxu3 %v4118_v2 }
 0x14f   :  { %2578 = vmatpush.bf16.msrb.mxu0 %v3906_v7  ;;  %v1949_v7 = vadd.f32 %v1948_v24, %v1936_v3  ;;  %v420_v3 = vperm.slane %v4809_v39, 3  ;;  %v4063_v39 = vld [vmem:[#allocation8 + $0x188] sm:$0xf0] }
 0x150   :  { %2591 = vmatpush.bf16.msrb.mxu1 %v3970_v9  ;;  %v4002_v9 = vor.u32 %v4475_v37, %v3999_v8  ;;  %v4495_v8 = vld [vmem:[#allocation8 + $0x1a4] sm:$0xf] }
 0x151   :  { %v1963_v52 = vpop.f32.mrf.mxu3  ;;  %v1962_v10 = vadd.f32 %v1961_v13, %v1949_v7  ;;  %v4085_v13 = vld [vmem:[#allocation8 + $0x1b0] sm:$0xf] }
 0x152   :  { %2604 = vmatpush.bf16.msrb.mxu2 %v4034_v47  ;;  %2563 = vmatpush.bf16.msra.mxu3 %v4110_v46  ;;  %v4119_v47 = vld [vmem:[#allocation8 + $0x1f8] sm:$0xf0]  ;;  %v4503_v52 = vld [vmem:[#allocation8 + $0x1e4] sm:$0xf] }
 0x153   :  { %2579 = vmatpush.bf16.msrb.mxu0 %v3898_v14  ;;  %v4101_v14 = vld [vmem:[#allocation8 + $0x1d0] sm:$0xf]  ;;  %v4122_v48 = vor.u32 %v4505_v44, %v4119_v47  ;;  %v4114_v55 = vor.u32 %v4503_v52, %v4111_v53 }
 0x154   :  { %2592 = vmatpush.bf16.msrb.mxu1 %v3962_v17  ;;  %v4102_v16 = vor.u32 %v4502_v15, %v4101_v14  ;;  %v4491_v14 = vld [vmem:[#allocation8 + $0x184] sm:$0xf]  ;;  %v4513_v52 = vld [vmem:[#allocation10 + $0x30] sm:$0xff] }
 0x155   :  { %v4066_v15 = vor.u32 %v4491_v14, %v4063_v39  ;;  %v4521_v53 = vld [vmem:[#allocation10 + $0x70] sm:$0xff] }
 0x156   :  { %2605 = vmatpush.bf16.msrb.mxu2 %v4026_v57  ;;  %2564 = vmatpush.bf16.msra.mxu3 %v4102_v16  ;;  %v4103_v57 = vld [vmem:[#allocation8 + $0x1d8] sm:$0xf0] }
 0x157   :  { %2580 = vmatpush.bf16.msrb.mxu0 %v3890_v25  ;;  %v4498_v25 = vld [vmem:[#allocation8 + $0x1b4] sm:$0xf0] }
 0x158   :  { %2593 = vmatpush.bf16.msrb.mxu1 %v3954_v28  ;;  %v4086_v28 = vor.u32 %v4498_v25, %v4085_v13 }
 0x15a   :  { %2606 = vmatpush.bf16.msrb.mxu2 %v4018_v1  ;;  %2565 = vmatpush.bf16.msra.mxu3 %v4094_v22  ;;  %v4095_v1 = vld [vmem:[#allocation8 + $0x1c8] sm:$0xf0] }
 0x15b   :  { %2581 = vmatpush.bf16.msrb.mxu0 %v3882_v50  ;;  %v4069_v50 = vld [vmem:[#allocation8 + $0x190] sm:$0xf]  ;;  %v4098_v2 = vor.u32 %v4499_v0, %v4095_v1  ;;  %v4508_v0 = vld [vmem:[#allocation10 + $0x8] sm:$0xff] }
 0x15c   :  { %2594 = vmatpush.bf16.msrb.mxu1 %v3946_v43  ;;  %v4070_v40 = vor.u32 %v4494_v31, %v4069_v50  ;;  %v4492_v43 = vld [vmem:[#allocation8 + $0x184] sm:$0xf0] }
 0x15d   :  { %v4062_v58 = vor.u32 %v4492_v43, %v4061_v42  ;;  %v4520_v1 = vld [vmem:[#allocation10 + $0x68] sm:$0xff] }
 0x15e   :  { %2607 = vmatpush.bf16.msrb.mxu2 %v4010_v6  ;;  %2566 = vmatpush.bf16.msra.mxu3 %v4086_v28  ;;  %v4087_v6 = vld [vmem:[#allocation8 + $0x1b8] sm:$0xf0] }
 0x15f   :  { %2582 = vmatpush.bf16.msrb.mxu0 %v3874_v56  ;;  %v1974_v11 = vpop.f32.mrf.mxu0  ;;  %v4501_v56 = vld [vmem:[#allocation8 + $0x1d4] sm:$0xf]  ;;  %v4090_v37 = vor.u32 %v4497_v5, %v4087_v6  ;;  %v4516_v6 = vld [vmem:[#allocation10 + $0x48] sm:$0xff] }
 0x160   :  { %2595 = vmatpush.bf16.msrb.mxu1 %v3938_v62  ;;  %v1975_v38 = vadd.f32 %v1974_v11, %v1962_v10  ;;  %v4106_v61 = vor.u32 %v4501_v56, %v4103_v57  ;;  %v4511_v56 = vld [vmem:[#allocation10 + $0x20] sm:$0xff]  ;;  %v4510_v57 = vld [vmem:[#allocation10 + $0x18] sm:$0xff]  ;;  %v4517_v5 = vld [vmem:[#allocation10 + $0x50] sm:$0xff] }
 0x162   :  { %2583 = vmatmul.bf16.vlgmr.msrb.gmra.mxu0 %v4805_v54  ;;  %2608 = vmatpush.bf16.msrb.mxu2 %v4002_v9  ;;  %v1987_v45 = vpop.f32.mrf.mxu1  ;;  %v4079_v9 = vld [vmem:[#allocation8 + $0x1a8] sm:$0xf0] }
 0x163   :  { %2596 = vmatmul.bf16.vlgmr.msrb.gmra.mxu1 %v4803_v49  ;;  %v1988_v54 = vadd.f32 %v1987_v45, %v1975_v38  ;;  %2567 = vmatpush.bf16.msra.mxu3 %v4078_v35  ;;  %v4082_v11 = vor.u32 %v4495_v8, %v4079_v9  ;;  %v4074_v45 = vor.u32 %v4493_v12, %v4071_v41 }
 0x166   :  { %v2000_v17 = vpop.f32.mrf.mxu2 }
 0x167   :  { %v2001_v19 = vadd.f32 %v2000_v17, %v1988_v54  ;;  %v1976_v24 = vpop.f32.mrf.mxu0  ;;  %2568 = vmatpush.bf16.msra.mxu3 %v4070_v40  ;;  %v2200_v40 = vperm.slane %v2197_v30, 1 }
 0x169   :  { %v2013_v49 = vpop.f32.mrf.mxu3 }
 0x16a   :  { %v2014_v23 = vadd.f32 %v2013_v49, %v2001_v19  ;;  %v1989_v26 = vpop.f32.mrf.mxu1 }
 0x16b   :  { %2569 = vmatpush.bf16.msra.mxu3 %v4062_v58 }
 0x16c   :  { %v2123_v27 = vmul.f32 0.2, %v2014_v23 }
 0x16e   :  { %v2127_v29 = vmax.f32 %v2014_v23, %v2123_v27  ;;  %v2002_v32 = vpop.f32.mrf.mxu2 }
 0x16f   :  { %2614 = vmatpush.bf16.msrb.mxu3 %v4122_v48 }
 0x170   :  { %v2131_v33 = vpack.c.bf16 %v2127_v29, %v2127_v29 }
 0x171   :  { %v2015_v34 = vpop.f32.mrf.mxu3 }
 0x172   :  { %2557 = vmatmul.bf16.vlgmr.msra.gmra.mxu2 %v2131_v33 }
 0x173   :  { %2615 = vmatpush.bf16.msrb.mxu3 %v4114_v55  ;;  %v4512_v55 = vld [vmem:[#allocation10 + $0x28] sm:$0xff] }
 0x177   :  { %2616 = vmatpush.bf16.msrb.mxu3 %v4106_v61  ;;  %v4509_v61 = vld [vmem:[#allocation10 + $0x10] sm:$0xff] }
 0x17b   :  { %2617 = vmatpush.bf16.msrb.mxu3 %v4098_v2  ;;  %v4507_v2 = vld [vmem:[#allocation10] sm:$0xff] }
 0x17f   :  { %v2026_v60 = vpop.f32.mrf.mxu0  ;;  %2618 = vmatpush.bf16.msrb.mxu3 %v4090_v37 }
 0x180   :  { %v2027_v10 = vadd.f32 %v2026_v60, %v420_v3  ;;  %v4514_v60 = vld [vmem:[#allocation10 + $0x38] sm:$0xff]  ;;  %v4519_v3 = vld [vmem:[#allocation10 + $0x60] sm:$0xff] }
 0x181   :  { %2761 = vmatpush.bf16.msra.mxu0 %v4514_v60 }
 0x182   :  { %v2039_v51 = vpop.f32.mrf.mxu1  ;;  %2609 = vmatmul.bf16.vlgmr.msrb.gmra.mxu2 %v2131_v33 }
 0x183   :  { %v2040_v38 = vadd.f32 %v2039_v51, %v2027_v10  ;;  %2619 = vmatpush.bf16.msrb.mxu3 %v4082_v11  ;;  %v4522_v51 = vld [vmem:[#allocation10 + $0x78] sm:$0xff] }
 0x184   :  { %2774 = vmatpush.bf16.msra.mxu1 %v4522_v51 }
 0x185   :  { %2762 = vmatpush.bf16.msra.mxu0 %v4513_v52 }
 0x186   :  { %v2052_v36 = vpop.f32.mrf.mxu2 }
 0x187   :  { %v2028_v62 = vpop.f32.mrf.mxu0  ;;  %v2053_v46 = vadd.f32 %v2052_v36, %v2040_v38  ;;  %2620 = vmatpush.bf16.msrb.mxu3 %v4074_v45 }
 0x188   :  { %2775 = vmatpush.bf16.msra.mxu1 %v4521_v53 }
 0x189   :  { %v2065_v59 = vpop.f32.mrf.mxu3  ;;  %2763 = vmatpush.bf16.msra.mxu0 %v4512_v55 }
 0x18a   :  { %v2041_v63 = vpop.f32.mrf.mxu1  ;;  %v2066_v54 = vadd.f32 %v2065_v59, %v2053_v46 }
 0x18b   :  { %2621 = vmatpush.bf16.msrb.mxu3 %v4066_v15 }
 0x18c   :  { %2776 = vmatpush.bf16.msra.mxu1 %v4520_v1 }
 0x18d   :  { %2764 = vmatpush.bf16.msra.mxu0 %v4511_v56 }
 0x18e   :  { %v2054_v4 = vpop.f32.mrf.mxu2 }
 0x18f   :  { %v4518_v4 = vld [vmem:[#allocation10 + $0x58] sm:$0xff] }
 0x190   :  { %2777 = vmatpush.bf16.msra.mxu1 %v4519_v3 }
 0x191   :  { %v2067_v7 = vpop.f32.mrf.mxu3  ;;  %2765 = vmatpush.bf16.msra.mxu0 %v4510_v57 }
 0x192   :  { %v4515_v7 = vld [vmem:[#allocation10 + $0x40] sm:$0xff] }
 0x194   :  { %2778 = vmatpush.bf16.msra.mxu1 %v4518_v4 }
 0x195   :  { %2766 = vmatpush.bf16.msra.mxu0 %v4509_v61 }
 0x198   :  { %2779 = vmatpush.bf16.msra.mxu1 %v4517_v5 }
 0x199   :  { %2767 = vmatpush.bf16.msra.mxu0 %v4508_v0 }
 0x19c   :  { %2780 = vmatpush.bf16.msra.mxu1 %v4516_v6 }
 0x19d   :  { %2768 = vmatpush.bf16.msra.mxu0 %v4507_v2 }
 0x19f   :  { %v2078_v16 = vpop.f32.mrf.mxu0 }
 0x1a0   :  { %v2091_v17 = vpop.f32.mrf.mxu1  ;;  %v2079_v19 = vadd.f32 %v2078_v16, %v2066_v54  ;;  %2781 = vmatpush.bf16.msra.mxu1 %v4515_v7 }
 0x1a2   :  { %v2092_v49 = vadd.f32 %v2091_v17, %v2079_v19  ;;  %v4534_v19 = vld [vmem:[#allocation2] ss:$0 sm:$0xff] }
 0x1a7   :  { %v2104_v20 = vpop.f32.mrf.mxu2  ;;  %v2080_v23 = vpop.f32.mrf.mxu0 }
 0x1a8   :  { %v2105_v21 = vadd.f32 %v2104_v20, %v2092_v49  ;;  %v2117_v22 = vpop.f32.mrf.mxu3  ;;  %v2093_v24 = vpop.f32.mrf.mxu1 }
 0x1aa   :  { %v2118_v13 = vadd.f32 %v2117_v22, %v2105_v21 }
 0x1ac   :  { %v2124_v25 = vmul.f32 0.2, %v2118_v13 }
 0x1ae   :  { %v2128_v26 = vmax.f32 %v2118_v13, %v2124_v25 }
 0x1af   :  { %v2106_v27 = vpop.f32.mrf.mxu2 }
 0x1b0   :  { %v2132_v28 = vpack.c.bf16 %v2128_v26, %v2128_v26  ;;  %v2119_v29 = vpop.f32.mrf.mxu3 }
 0x1b2   :  { %2570 = vmatmul.bf16.vlgmr.msra.gmra.mxu3 %v2132_v28 }
 0x1bf   :  { %v2532_v32 = vpop.f32.mrf.mxu0 }
 0x1c0   :  { %v2533_v33 = vadd.f32 %v2532_v32, %v2199_v18  ;;  %v2545_v34 = vpop.f32.mrf.mxu1 }
 0x1c2   :  { %v2546_v35 = vadd.f32 %v2545_v34, %v2533_v33  ;;  %2622 = vmatmul.bf16.vlgmr.msrb.gmra.mxu3 %v2132_v28 }
 0x1c7   :  { %v2534_v50 = vpop.f32.mrf.mxu0 }
 0x1c8   :  { %v2547_v31 = vpop.f32.mrf.mxu1 }
 0x1df   :  { %v2584_v42 = vpop.f32.mrf.mxu0 }
 0x1e0   :  { %v2585_v43 = vadd.f32 %v2584_v42, %v2200_v40  ;;  %v2597_v58 = vpop.f32.mrf.mxu1 }
 0x1e2   :  { %v2598_v44 = vadd.f32 %v2597_v58, %v2585_v43 }
 0x1e7   :  { %v2586_v47 = vpop.f32.mrf.mxu0 }
 0x1e8   :  { %v2599_v48 = vpop.f32.mrf.mxu1 }
 0x1f5   :  { %v2558_v36 = vpop.f32.mrf.mxu2 }
 0x1f6   :  { %v2559_v37 = vadd.f32 %v2558_v36, %v2546_v35 }
 0x1fd   :  { %v2560_v59 = vpop.f32.mrf.mxu2 }
 0x205   :  { %v2610_v62 = vpop.f32.mrf.mxu2 }
 0x206   :  { %v2611_v38 = vadd.f32 %v2610_v62, %v2598_v44 }
 0x20d   :  { %v2612_v63 = vpop.f32.mrf.mxu2 }
 0x235   :  { %v2571_v8 = vpop.f32.mrf.mxu3 }
 0x236   :  { %v2572_v9 = vadd.f32 %v2571_v8, %v2559_v37 }
 0x238   :  { %v2627_v10 = vmul.f32 0.2, %v2572_v9 }
 0x23a   :  { %v2629_v11 = vmax.f32 %v2572_v9, %v2627_v10 }
 0x23c   :  { %v2631_v12 = vpack.c.bf16 %v2629_v11, %v2629_v11 }
 0x23d   :  { %v2573_v41 = vpop.f32.mrf.mxu3 }
 0x23e   :  { %2769 = vmatmul.bf16.vlgmr.msra.gmra.mxu0 %v2631_v12 }
 0x245   :  { %v2623_v45 = vpop.f32.mrf.mxu3 }
 0x246   :  { %v2624_v46 = vadd.f32 %v2623_v45, %v2611_v38 }
 0x248   :  { %v2628_v14 = vmul.f32 0.2, %v2624_v46 }
 0x24a   :  { %v2630_v39 = vmax.f32 %v2624_v46, %v2628_v14 }
 0x24c   :  { %v2632_v15 = vpack.c.bf16 %v2630_v39, %v2630_v39 }
 0x24d   :  { %v2625_v54 = vpop.f32.mrf.mxu3 }
 0x24e   :  { %2782 = vmatmul.bf16.vlgmr.msra.gmra.mxu1 %v2632_v15 }
 0x2bb   :  { %v2770_v16 = vpop.f32.mrf.mxu0 }
 0x2c3   :  { %v2772_v17 = vpop.f32.mrf.mxu0 }
 0x2cb   :  { %v2783_v49 = vpop.f32.mrf.mxu1 }
 0x2cc   :  { %v2784_v20 = vadd.f32 %v2783_v49, %v2770_v16 }
 0x2ce   :  { %v2791_v21 = vadd.f32 %v4534_v19, %v2784_v20 }
 0x2d0   :  { %v2792_v22 = vsub.f32 0.0, %v2791_v21 }
 0x2d2   :  { %v2793_v23 = vmul.f32 1.442695, %v2792_v22 }
 0x2d3   :  { %v2785_v24 = vpop.f32.mrf.mxu1 }
 0x2d4   :  { %4535 = vpow2.f32 %v2793_v23 }
 0x2da   :  { %v4536_v13 = vpop.eup %4535 }
 0x2db   :  { %v2795_v25 = vadd.f32 1.0, %v4536_v13 }
 0x2dd   :  { %4537 = vrcp.f32 %v2795_v25 }
 0x2e3   :  { %v4538_v26 = vpop.eup %4537 }
 0x2e4   :  { %2798 = vst.msk [vmem:[#allocation11] sm:$0xff] %vm2797_vm0, %v4538_v26 }
 0x2eb   :  { %v2817_v27 = vld [vmem:[#allocation11] sm:$0x3] }
 0x2ec   :  { %2818 = vst [vmem:[%s4828_s7] sm:$0x3] %v2817_v27 }
 0x2ed   :  { %2836 = vsyncpa [#allocation4], 1 }
 0x2ee   :  { %2837 = vsyncpa [#allocation6], 1 }
 0x2ef   :  { %2838 = vsyncpa [#allocation9], 1 }

</bundles_post_ra>
